<compile_context>
chip_gen: v6e
topology: v6e:2x2x1
jax: 0.10.0
libtpu: 0.0.40
codegen_flags: <defaults>
</compile_context>

<pallas_src>
import jax
import jax.numpy as jnp
from jax.experimental import pallas as pl
from jax.experimental.pallas import tpu as pltpu


def lstm_kernel(gx_ref, whh_ref, out_ref, h_scr, c_scr):
    """One grid step == TB timesteps of the LSTM recurrence.

    gx_ref  : (TB, 4, B, H)  precomputed x@W_ih^T + (b_ih+b_hh), gate-major (i,f,g,o)
    whh_ref : (4, H, H)      W_hh^T per gate (gate-major)
    out_ref : (TB, B, H)     hidden states for this time block
    h_scr   : (B, H)         carried hidden state (VMEM scratch)
    c_scr   : (B, H)         carried cell state   (VMEM scratch)
    """
    @pl.when(pl.program_id(0) == 0)
    def _():
        h_scr[...] = jnp.zeros_like(h_scr)
        c_scr[...] = jnp.zeros_like(c_scr)

    tb = gx_ref.shape[0]

    def step(t, carry):
        h = h_scr[...]
        gx = gx_ref[t]  # (4, B, H) — dynamic load along leading (non-lane) axis
        # Four lane-aligned (B,H)x(H,H) matmuls; each gate is a whole tile, so
        # the nonlinearities and elementwise products never cross lane slices.
        i_g = jax.nn.sigmoid(gx[0] + jnp.dot(h, whh_ref[0],
                                             preferred_element_type=jnp.float32))
        f_g = jax.nn.sigmoid(gx[1] + jnp.dot(h, whh_ref[1],
                                             preferred_element_type=jnp.float32))
        g_g = jnp.tanh(gx[2] + jnp.dot(h, whh_ref[2],
                                       preferred_element_type=jnp.float32))
        o_g = jax.nn.sigmoid(gx[3] + jnp.dot(h, whh_ref[3],
                                             preferred_element_type=jnp.float32))
        c_new = f_g * c_scr[...] + i_g * g_g
        h_new = o_g * jnp.tanh(c_new)
        c_scr[...] = c_new
        h_scr[...] = h_new
        out_ref[t] = h_new  # VMEM store; HBM writeback happens once per block
        return carry

    jax.lax.fori_loop(0, tb, step, 0, unroll=True)


def lstm_recurrence_pallas(gates_x, whh_gm, *, time_block=8):
    """gates_x: (T, 4, B, H) f32 gate-major inputs; whh_gm: (4, H, H) f32.

    Returns all hidden states, shape (T, B, H) f32.
    """
    T, G, B, H = gates_x.shape
    assert G == 4
    tb = min(time_block, T)
    num_blocks = pl.cdiv(T, tb)
    T_pad = num_blocks * tb
    if T_pad != T:
        # Pad trailing timesteps with zeros; their outputs are dropped below.
        gates_x = jnp.pad(gates_x, ((0, T_pad - T), (0, 0), (0, 0), (0, 0)))

    out = pl.pallas_call(
        lstm_kernel,
        out_shape=jax.ShapeDtypeStruct((T_pad, B, H), jnp.float32),
        grid_spec=pltpu.PrefetchScalarGridSpec(
            num_scalar_prefetch=0,
            grid=(num_blocks,),
            in_specs=[
                pl.BlockSpec((tb, 4, B, H), lambda i: (i, 0, 0, 0)),
                pl.BlockSpec((4, H, H), lambda i: (0, 0, 0)),  # constant weights
            ],
            out_specs=pl.BlockSpec((tb, B, H), lambda i: (i, 0, 0)),
            scratch_shapes=[
                pltpu.VMEM((B, H), jnp.float32),  # h carry
                pltpu.VMEM((B, H), jnp.float32),  # c carry
            ],
        ),
        compiler_params=pltpu.CompilerParams(
            # The time axis carries the recurrence through VMEM scratch.
            # It MUST stay "arbitrary" (sequential); "parallel" would corrupt it.
            dimension_semantics=("arbitrary",),
        ),
    )(gates_x, whh_gm)
    return out[:T]


def model_forward(x_tokens, params, *, time_block=8):
    """Equivalent of Model.forward: embedding + input projection folded into a
    gather (glue), then the Pallas LSTM recurrence over the serial time axis."""
    H = params["w_hh"].shape[1]
    # Fold Embedding -> Linear input projection (no nonlinearity in between):
    # proj_table[v] = embedding[v] @ W_ih^T + (b_ih + b_hh)   -> (vocab, 4H)
    proj_table = (
        jnp.dot(params["embedding"], params["w_ih"].T,
                precision=jax.lax.Precision.HIGHEST)
        + (params["b_ih"] + params["b_hh"])
    )
    gates_x = jnp.take(proj_table, x_tokens, axis=0)              # (T, B, 4H)
    T, B, _ = gates_x.shape
    # gate-major layout: (T, B, 4H) -> (T, 4, B, H)
    gates_x = gates_x.reshape(T, B, 4, H).transpose(0, 2, 1, 3)
    # W_hh gate-major: whh_gm[k] = W_hh[k*H:(k+1)*H, :].T  -> (4, H, H)
    whh_gm = jnp.transpose(params["w_hh"].reshape(4, H, H), (0, 2, 1))
    return lstm_recurrence_pallas(gates_x, whh_gm, time_block=time_block)


def make_params(key, vocab_size, embedding_dim, hidden_size, tag_size):
    """Deterministic synthetic init matching PyTorch parameter shapes."""
    k = jax.random.split(key, 7)
    s = 1.0 / jnp.sqrt(hidden_size)
    return {
        # nn.Embedding(vocab_size, embedding_dim)
        "embedding": jax.random.normal(k[0], (vocab_size, embedding_dim), jnp.float32),
        # nn.LSTM(embedding_dim, hidden_size): weight_ih_l0 (4H,E), weight_hh_l0 (4H,H)
        "w_ih": jax.random.uniform(k[1], (4 * hidden_size, embedding_dim), jnp.float32, -s, s),
        "w_hh": jax.random.uniform(k[2], (4 * hidden_size, hidden_size), jnp.float32, -s, s),
        "b_ih": jax.random.uniform(k[3], (4 * hidden_size,), jnp.float32, -s, s),
        "b_hh": jax.random.uniform(k[4], (4 * hidden_size,), jnp.float32, -s, s),
        # nn.Linear(hidden_size, tag_size) — used only by .decode(), not forward()
        "f_h_w": jax.random.uniform(k[5], (tag_size, hidden_size), jnp.float32, -s, s),
        "f_h_b": jax.random.uniform(k[6], (tag_size,), jnp.float32, -s, s),
    }


def _reference_lstm(emb, w_ih, w_hh, b_ih, b_hh):
    """Pure-JAX reference (lax.scan), PyTorch LSTM semantics."""
    T, B, E = emb.shape
    H = w_hh.shape[1]

    def step(carry, x_t):
        h, c = carry
        gates = x_t @ w_ih.T + b_ih + h @ w_hh.T + b_hh
        i, f, g, o = jnp.split(gates, 4, axis=-1)
        c = jax.nn.sigmoid(f) * c + jax.nn.sigmoid(i) * jnp.tanh(g)
        h = jax.nn.sigmoid(o) * jnp.tanh(c)
        return (h, c), h

    init = (jnp.zeros((B, H), jnp.float32), jnp.zeros((B, H), jnp.float32))
    _, hs = jax.lax.scan(step, init, emb)
    return hs


if __name__ == "__main__":
    vocab_size = 50
    embedding_dim = 16
    hidden_size = 32
    tag_size = 10
    seq_len = 8
    batch = 2

    key = jax.random.PRNGKey(0)
    k_params, k_x, k_x2 = jax.random.split(key, 3)

    params = make_params(k_params, vocab_size, embedding_dim, hidden_size, tag_size)
    # x: (seq_len, batch) token ids — nn.LSTM default is seq-first
    x = jax.random.randint(k_x, (seq_len, batch), 0, vocab_size, dtype=jnp.int32)

    # Primary run: T == time_block -> single grid step (whole sequence per block).
    h = model_forward(x, params)
    h = jax.block_until_ready(h)

    emb = jnp.take(params["embedding"], x, axis=0)
    h_ref = _reference_lstm(emb, params["w_ih"], params["w_hh"],
                            params["b_ih"], params["b_hh"])
    assert h.shape == (seq_len, batch, hidden_size)
    assert jnp.allclose(h, h_ref, atol=1e-4, rtol=1e-4)

    # Secondary run: longer sequence so the (h, c) carry crosses grid steps and
    # the time-padding path is exercised (T=12, time_block=8 -> 2 grid steps).
    seq_len2 = 12
    x2 = jax.random.randint(k_x2, (seq_len2, batch), 0, vocab_size, dtype=jnp.int32)
    h2 = jax.block_until_ready(model_forward(x2, params, time_block=8))
    emb2 = jnp.take(params["embedding"], x2, axis=0)
    h2_ref = _reference_lstm(emb2, params["w_ih"], params["w_hh"],
                             params["b_ih"], params["b_hh"])
    assert h2.shape == (seq_len2, batch, hidden_size)
    assert jnp.allclose(h2, h2_ref, atol=1e-4, rtol=1e-4)

    print("KERNEL_OK")
</pallas_src>

<mosaic_0001>
module attributes {stable_mosaic.version = 11 : i64} {
  func.func @lstm_kernel(%arg0: i32, %arg1: memref<8x4x2x32xf32, #tpu.memory_space<vmem>>, %arg2: memref<4x32x32xf32, #tpu.memory_space<vmem>>, %arg3: memref<8x2x32xf32, #tpu.memory_space<vmem>>, %arg4: memref<2x32xf32, #tpu.memory_space<vmem>>, %arg5: memref<2x32xf32, #tpu.memory_space<vmem>>) attributes {dimension_semantics = [#tpu.dimension_semantics<arbitrary>], iteration_bounds = array<i64: 1>, scalar_prefetch = 0 : i64, scratch_operands = 2 : i64, tpu.core_type = #tpu.core_type<tc>, window_params = [{transform_indices = @transform_0, window_bounds = array<i64: 8, 4, 2, 32>}, {pipeline_mode = #tpu.pipeline_mode<synchronous>, transform_indices = @transform_1, window_bounds = array<i64: 4, 32, 32>}, {transform_indices = @transform_2, window_bounds = array<i64: 8, 2, 32>}]} {
    %c0_i32 = arith.constant 0 : i32
    %0 = arith.cmpi eq, %arg0, %c0_i32 : i32
    %1 = arith.extui %0 : i1 to i32
    %c0_i32_0 = arith.constant 0 : i32
    %2 = arith.cmpi ne, %1, %c0_i32_0 : i32
    scf.if %2 {
      %cst_253 = arith.constant 0.000000e+00 : f32
      %451 = vector.broadcast %cst_253 : f32 to vector<2x32xf32>
      %c0_254 = arith.constant 0 : index
      %c0_255 = arith.constant 0 : index
      %452 = vector.load %arg4[%c0_254, %c0_255] : memref<2x32xf32, #tpu.memory_space<vmem>>, vector<2x32xf32>
      tpu.vector_store %arg4[%c0_254, %c0_255], %451 {strides = array<i32>} : memref<2x32xf32, #tpu.memory_space<vmem>>, vector<2x32xf32>,
      %cst_256 = arith.constant 0.000000e+00 : f32
      %453 = vector.broadcast %cst_256 : f32 to vector<2x32xf32>
      %c0_257 = arith.constant 0 : index
      %c0_258 = arith.constant 0 : index
      %454 = vector.load %arg5[%c0_257, %c0_258] : memref<2x32xf32, #tpu.memory_space<vmem>>, vector<2x32xf32>
      tpu.vector_store %arg5[%c0_257, %c0_258], %453 {strides = array<i32>} : memref<2x32xf32, #tpu.memory_space<vmem>>, vector<2x32xf32>,
    } else {
    }
    %c0_i32_1 = arith.constant 0 : i32
    %c0 = arith.constant 0 : index
    %c0_2 = arith.constant 0 : index
    %3 = vector.load %arg4[%c0, %c0_2] : memref<2x32xf32, #tpu.memory_space<vmem>>, vector<2x32xf32>
    %4 = arith.index_cast %c0_i32_1 : i32 to index
    %c0_3 = arith.constant 0 : index
    %c0_4 = arith.constant 0 : index
    %c0_5 = arith.constant 0 : index
    %5 = vector.load %arg1[%4, %c0_3, %c0_4, %c0_5] : memref<8x4x2x32xf32, #tpu.memory_space<vmem>>, vector<1x4x2x32xf32>
    %6 = vector.shape_cast %5 : vector<1x4x2x32xf32> to vector<4x2x32xf32>
    %7 = vector.extract_strided_slice %6 {offsets = [0, 0, 0], sizes = [1, 2, 32], strides = [1, 1, 1]} : vector<4x2x32xf32> to vector<1x2x32xf32>
    %8 = vector.shape_cast %7 : vector<1x2x32xf32> to vector<2x32xf32>
    %c0_6 = arith.constant 0 : index
    %c0_7 = arith.constant 0 : index
    %c0_8 = arith.constant 0 : index
    %9 = vector.load %arg2[%c0_6, %c0_7, %c0_8] : memref<4x32x32xf32, #tpu.memory_space<vmem>>, vector<1x32x32xf32>
    %10 = vector.shape_cast %9 : vector<1x32x32xf32> to vector<32x32xf32>
    %cst = arith.constant dense<0.000000e+00> : vector<2x32xf32>
    %11 = tpu.matmul %3, %10, %cst {dimension_numbers = #tpu.dot_dimension_numbers<[1], [0], [0], [1], [0, 0, 1, 1], [], []>} : vector<2x32xf32>, vector<32x32xf32>, vector<2x32xf32> -> vector<2x32xf32>
    %12 = arith.addf %8, %11 : vector<2x32xf32>
    %13 = arith.negf %12 : vector<2x32xf32>
    %14 = math.exp %13 : vector<2x32xf32>
    %cst_9 = arith.constant 1.000000e+00 : f32
    %15 = vector.broadcast %cst_9 : f32 to vector<2x32xf32>
    %16 = arith.addf %15, %14 : vector<2x32xf32>
    %17 = arith.divf %15, %16 : vector<2x32xf32>
    %18 = vector.extract_strided_slice %6 {offsets = [1, 0, 0], sizes = [1, 2, 32], strides = [1, 1, 1]} : vector<4x2x32xf32> to vector<1x2x32xf32>
    %19 = vector.shape_cast %18 : vector<1x2x32xf32> to vector<2x32xf32>
    %c1 = arith.constant 1 : index
    %c0_10 = arith.constant 0 : index
    %c0_11 = arith.constant 0 : index
    %20 = vector.load %arg2[%c1, %c0_10, %c0_11] : memref<4x32x32xf32, #tpu.memory_space<vmem>>, vector<1x32x32xf32>
    %21 = vector.shape_cast %20 : vector<1x32x32xf32> to vector<32x32xf32>
    %cst_12 = arith.constant dense<0.000000e+00> : vector<2x32xf32>
    %22 = tpu.matmul %3, %21, %cst_12 {dimension_numbers = #tpu.dot_dimension_numbers<[1], [0], [0], [1], [0, 0, 1, 1], [], []>} : vector<2x32xf32>, vector<32x32xf32>, vector<2x32xf32> -> vector<2x32xf32>
    %23 = arith.addf %19, %22 : vector<2x32xf32>
    %24 = arith.negf %23 : vector<2x32xf32>
    %25 = math.exp %24 : vector<2x32xf32>
    %cst_13 = arith.constant 1.000000e+00 : f32
    %26 = vector.broadcast %cst_13 : f32 to vector<2x32xf32>
    %27 = arith.addf %26, %25 : vector<2x32xf32>
    %28 = arith.divf %26, %27 : vector<2x32xf32>
    %29 = vector.extract_strided_slice %6 {offsets = [2, 0, 0], sizes = [1, 2, 32], strides = [1, 1, 1]} : vector<4x2x32xf32> to vector<1x2x32xf32>
    %30 = vector.shape_cast %29 : vector<1x2x32xf32> to vector<2x32xf32>
    %c2 = arith.constant 2 : index
    %c0_14 = arith.constant 0 : index
    %c0_15 = arith.constant 0 : index
    %31 = vector.load %arg2[%c2, %c0_14, %c0_15] : memref<4x32x32xf32, #tpu.memory_space<vmem>>, vector<1x32x32xf32>
    %32 = vector.shape_cast %31 : vector<1x32x32xf32> to vector<32x32xf32>
    %cst_16 = arith.constant dense<0.000000e+00> : vector<2x32xf32>
    %33 = tpu.matmul %3, %32, %cst_16 {dimension_numbers = #tpu.dot_dimension_numbers<[1], [0], [0], [1], [0, 0, 1, 1], [], []>} : vector<2x32xf32>, vector<32x32xf32>, vector<2x32xf32> -> vector<2x32xf32>
    %34 = arith.addf %30, %33 : vector<2x32xf32>
    %35 = math.tanh %34 : vector<2x32xf32>
    %36 = vector.extract_strided_slice %6 {offsets = [3, 0, 0], sizes = [1, 2, 32], strides = [1, 1, 1]} : vector<4x2x32xf32> to vector<1x2x32xf32>
    %37 = vector.shape_cast %36 : vector<1x2x32xf32> to vector<2x32xf32>
    %c3 = arith.constant 3 : index
    %c0_17 = arith.constant 0 : index
    %c0_18 = arith.constant 0 : index
    %38 = vector.load %arg2[%c3, %c0_17, %c0_18] : memref<4x32x32xf32, #tpu.memory_space<vmem>>, vector<1x32x32xf32>
    %39 = vector.shape_cast %38 : vector<1x32x32xf32> to vector<32x32xf32>
    %cst_19 = arith.constant dense<0.000000e+00> : vector<2x32xf32>
    %40 = tpu.matmul %3, %39, %cst_19 {dimension_numbers = #tpu.dot_dimension_numbers<[1], [0], [0], [1], [0, 0, 1, 1], [], []>} : vector<2x32xf32>, vector<32x32xf32>, vector<2x32xf32> -> vector<2x32xf32>
    %41 = arith.addf %37, %40 : vector<2x32xf32>
    %42 = arith.negf %41 : vector<2x32xf32>
    %43 = math.exp %42 : vector<2x32xf32>
    %cst_20 = arith.constant 1.000000e+00 : f32
    %44 = vector.broadcast %cst_20 : f32 to vector<2x32xf32>
    %45 = arith.addf %44, %43 : vector<2x32xf32>
    %46 = arith.divf %44, %45 : vector<2x32xf32>
    %c0_21 = arith.constant 0 : index
    %c0_22 = arith.constant 0 : index
    %47 = vector.load %arg5[%c0_21, %c0_22] : memref<2x32xf32, #tpu.memory_space<vmem>>, vector<2x32xf32>
    %48 = arith.mulf %28, %47 : vector<2x32xf32>
    %49 = arith.mulf %17, %35 : vector<2x32xf32>
    %50 = arith.addf %48, %49 : vector<2x32xf32>
    %51 = math.tanh %50 : vector<2x32xf32>
    %52 = arith.mulf %46, %51 : vector<2x32xf32>
    %c0_23 = arith.constant 0 : index
    %c0_24 = arith.constant 0 : index
    %53 = vector.load %arg5[%c0_23, %c0_24] : memref<2x32xf32, #tpu.memory_space<vmem>>, vector<2x32xf32>
    tpu.vector_store %arg5[%c0_23, %c0_24], %50 {strides = array<i32>} : memref<2x32xf32, #tpu.memory_space<vmem>>, vector<2x32xf32>,
    %c0_25 = arith.constant 0 : index
    %c0_26 = arith.constant 0 : index
    %54 = vector.load %arg4[%c0_25, %c0_26] : memref<2x32xf32, #tpu.memory_space<vmem>>, vector<2x32xf32>
    tpu.vector_store %arg4[%c0_25, %c0_26], %52 {strides = array<i32>} : memref<2x32xf32, #tpu.memory_space<vmem>>, vector<2x32xf32>,
    %55 = arith.index_cast %c0_i32_1 : i32 to index
    %c0_27 = arith.constant 0 : index
    %c0_28 = arith.constant 0 : index
    %56 = vector.load %arg3[%55, %c0_27, %c0_28] : memref<8x2x32xf32, #tpu.memory_space<vmem>>, vector<1x2x32xf32>
    %57 = vector.shape_cast %56 : vector<1x2x32xf32> to vector<2x32xf32>
    %58 = vector.shape_cast %52 : vector<2x32xf32> to vector<1x2x32xf32>
    tpu.vector_store %arg3[%55, %c0_27, %c0_28], %58 {strides = array<i32>} : memref<8x2x32xf32, #tpu.memory_space<vmem>>, vector<1x2x32xf32>,
    %c1_i32 = arith.constant 1 : i32
    %c0_29 = arith.constant 0 : index
    %c0_30 = arith.constant 0 : index
    %59 = vector.load %arg4[%c0_29, %c0_30] : memref<2x32xf32, #tpu.memory_space<vmem>>, vector<2x32xf32>
    %60 = arith.index_cast %c1_i32 : i32 to index
    %c0_31 = arith.constant 0 : index
    %c0_32 = arith.constant 0 : index
    %c0_33 = arith.constant 0 : index
    %61 = vector.load %arg1[%60, %c0_31, %c0_32, %c0_33] : memref<8x4x2x32xf32, #tpu.memory_space<vmem>>, vector<1x4x2x32xf32>
    %62 = vector.shape_cast %61 : vector<1x4x2x32xf32> to vector<4x2x32xf32>
    %63 = vector.extract_strided_slice %62 {offsets = [0, 0, 0], sizes = [1, 2, 32], strides = [1, 1, 1]} : vector<4x2x32xf32> to vector<1x2x32xf32>
    %64 = vector.shape_cast %63 : vector<1x2x32xf32> to vector<2x32xf32>
    %c0_34 = arith.constant 0 : index
    %c0_35 = arith.constant 0 : index
    %c0_36 = arith.constant 0 : index
    %65 = vector.load %arg2[%c0_34, %c0_35, %c0_36] : memref<4x32x32xf32, #tpu.memory_space<vmem>>, vector<1x32x32xf32>
    %66 = vector.shape_cast %65 : vector<1x32x32xf32> to vector<32x32xf32>
    %cst_37 = arith.constant dense<0.000000e+00> : vector<2x32xf32>
    %67 = tpu.matmul %59, %66, %cst_37 {dimension_numbers = #tpu.dot_dimension_numbers<[1], [0], [0], [1], [0, 0, 1, 1], [], []>} : vector<2x32xf32>, vector<32x32xf32>, vector<2x32xf32> -> vector<2x32xf32>
    %68 = arith.addf %64, %67 : vector<2x32xf32>
    %69 = arith.negf %68 : vector<2x32xf32>
    %70 = math.exp %69 : vector<2x32xf32>
    %cst_38 = arith.constant 1.000000e+00 : f32
    %71 = vector.broadcast %cst_38 : f32 to vector<2x32xf32>
    %72 = arith.addf %71, %70 : vector<2x32xf32>
    %73 = arith.divf %71, %72 : vector<2x32xf32>
    %74 = vector.extract_strided_slice %62 {offsets = [1, 0, 0], sizes = [1, 2, 32], strides = [1, 1, 1]} : vector<4x2x32xf32> to vector<1x2x32xf32>
    %75 = vector.shape_cast %74 : vector<1x2x32xf32> to vector<2x32xf32>
    %c1_39 = arith.constant 1 : index
    %c0_40 = arith.constant 0 : index
    %c0_41 = arith.constant 0 : index
    %76 = vector.load %arg2[%c1_39, %c0_40, %c0_41] : memref<4x32x32xf32, #tpu.memory_space<vmem>>, vector<1x32x32xf32>
    %77 = vector.shape_cast %76 : vector<1x32x32xf32> to vector<32x32xf32>
    %cst_42 = arith.constant dense<0.000000e+00> : vector<2x32xf32>
    %78 = tpu.matmul %59, %77, %cst_42 {dimension_numbers = #tpu.dot_dimension_numbers<[1], [0], [0], [1], [0, 0, 1, 1], [], []>} : vector<2x32xf32>, vector<32x32xf32>, vector<2x32xf32> -> vector<2x32xf32>
    %79 = arith.addf %75, %78 : vector<2x32xf32>
    %80 = arith.negf %79 : vector<2x32xf32>
    %81 = math.exp %80 : vector<2x32xf32>
    %cst_43 = arith.constant 1.000000e+00 : f32
    %82 = vector.broadcast %cst_43 : f32 to vector<2x32xf32>
    %83 = arith.addf %82, %81 : vector<2x32xf32>
    %84 = arith.divf %82, %83 : vector<2x32xf32>
    %85 = vector.extract_strided_slice %62 {offsets = [2, 0, 0], sizes = [1, 2, 32], strides = [1, 1, 1]} : vector<4x2x32xf32> to vector<1x2x32xf32>
    %86 = vector.shape_cast %85 : vector<1x2x32xf32> to vector<2x32xf32>
    %c2_44 = arith.constant 2 : index
    %c0_45 = arith.constant 0 : index
    %c0_46 = arith.constant 0 : index
    %87 = vector.load %arg2[%c2_44, %c0_45, %c0_46] : memref<4x32x32xf32, #tpu.memory_space<vmem>>, vector<1x32x32xf32>
    %88 = vector.shape_cast %87 : vector<1x32x32xf32> to vector<32x32xf32>
    %cst_47 = arith.constant dense<0.000000e+00> : vector<2x32xf32>
    %89 = tpu.matmul %59, %88, %cst_47 {dimension_numbers = #tpu.dot_dimension_numbers<[1], [0], [0], [1], [0, 0, 1, 1], [], []>} : vector<2x32xf32>, vector<32x32xf32>, vector<2x32xf32> -> vector<2x32xf32>
    %90 = arith.addf %86, %89 : vector<2x32xf32>
    %91 = math.tanh %90 : vector<2x32xf32>
    %92 = vector.extract_strided_slice %62 {offsets = [3, 0, 0], sizes = [1, 2, 32], strides = [1, 1, 1]} : vector<4x2x32xf32> to vector<1x2x32xf32>
    %93 = vector.shape_cast %92 : vector<1x2x32xf32> to vector<2x32xf32>
    %c3_48 = arith.constant 3 : index
    %c0_49 = arith.constant 0 : index
    %c0_50 = arith.constant 0 : index
    %94 = vector.load %arg2[%c3_48, %c0_49, %c0_50] : memref<4x32x32xf32, #tpu.memory_space<vmem>>, vector<1x32x32xf32>
    %95 = vector.shape_cast %94 : vector<1x32x32xf32> to vector<32x32xf32>
    %cst_51 = arith.constant dense<0.000000e+00> : vector<2x32xf32>
    %96 = tpu.matmul %59, %95, %cst_51 {dimension_numbers = #tpu.dot_dimension_numbers<[1], [0], [0], [1], [0, 0, 1, 1], [], []>} : vector<2x32xf32>, vector<32x32xf32>, vector<2x32xf32> -> vector<2x32xf32>
    %97 = arith.addf %93, %96 : vector<2x32xf32>
    %98 = arith.negf %97 : vector<2x32xf32>
    %99 = math.exp %98 : vector<2x32xf32>
    %cst_52 = arith.constant 1.000000e+00 : f32
    %100 = vector.broadcast %cst_52 : f32 to vector<2x32xf32>
    %101 = arith.addf %100, %99 : vector<2x32xf32>
    %102 = arith.divf %100, %101 : vector<2x32xf32>
    %c0_53 = arith.constant 0 : index
    %c0_54 = arith.constant 0 : index
    %103 = vector.load %arg5[%c0_53, %c0_54] : memref<2x32xf32, #tpu.memory_space<vmem>>, vector<2x32xf32>
    %104 = arith.mulf %84, %103 : vector<2x32xf32>
    %105 = arith.mulf %73, %91 : vector<2x32xf32>
    %106 = arith.addf %104, %105 : vector<2x32xf32>
    %107 = math.tanh %106 : vector<2x32xf32>
    %108 = arith.mulf %102, %107 : vector<2x32xf32>
    %c0_55 = arith.constant 0 : index
    %c0_56 = arith.constant 0 : index
    %109 = vector.load %arg5[%c0_55, %c0_56] : memref<2x32xf32, #tpu.memory_space<vmem>>, vector<2x32xf32>
    tpu.vector_store %arg5[%c0_55, %c0_56], %106 {strides = array<i32>} : memref<2x32xf32, #tpu.memory_space<vmem>>, vector<2x32xf32>,
    %c0_57 = arith.constant 0 : index
    %c0_58 = arith.constant 0 : index
    %110 = vector.load %arg4[%c0_57, %c0_58] : memref<2x32xf32, #tpu.memory_space<vmem>>, vector<2x32xf32>
    tpu.vector_store %arg4[%c0_57, %c0_58], %108 {strides = array<i32>} : memref<2x32xf32, #tpu.memory_space<vmem>>, vector<2x32xf32>,
    %111 = arith.index_cast %c1_i32 : i32 to index
    %c0_59 = arith.constant 0 : index
    %c0_60 = arith.constant 0 : index
    %112 = vector.load %arg3[%111, %c0_59, %c0_60] : memref<8x2x32xf32, #tpu.memory_space<vmem>>, vector<1x2x32xf32>
    %113 = vector.shape_cast %112 : vector<1x2x32xf32> to vector<2x32xf32>
    %114 = vector.shape_cast %108 : vector<2x32xf32> to vector<1x2x32xf32>
    tpu.vector_store %arg3[%111, %c0_59, %c0_60], %114 {strides = array<i32>} : memref<8x2x32xf32, #tpu.memory_space<vmem>>, vector<1x2x32xf32>,
    %c2_i32 = arith.constant 2 : i32
    %c0_61 = arith.constant 0 : index
    %c0_62 = arith.constant 0 : index
    %115 = vector.load %arg4[%c0_61, %c0_62] : memref<2x32xf32, #tpu.memory_space<vmem>>, vector<2x32xf32>
    %116 = arith.index_cast %c2_i32 : i32 to index
    %c0_63 = arith.constant 0 : index
    %c0_64 = arith.constant 0 : index
    %c0_65 = arith.constant 0 : index
    %117 = vector.load %arg1[%116, %c0_63, %c0_64, %c0_65] : memref<8x4x2x32xf32, #tpu.memory_space<vmem>>, vector<1x4x2x32xf32>
    %118 = vector.shape_cast %117 : vector<1x4x2x32xf32> to vector<4x2x32xf32>
    %119 = vector.extract_strided_slice %118 {offsets = [0, 0, 0], sizes = [1, 2, 32], strides = [1, 1, 1]} : vector<4x2x32xf32> to vector<1x2x32xf32>
    %120 = vector.shape_cast %119 : vector<1x2x32xf32> to vector<2x32xf32>
    %c0_66 = arith.constant 0 : index
    %c0_67 = arith.constant 0 : index
    %c0_68 = arith.constant 0 : index
    %121 = vector.load %arg2[%c0_66, %c0_67, %c0_68] : memref<4x32x32xf32, #tpu.memory_space<vmem>>, vector<1x32x32xf32>
    %122 = vector.shape_cast %121 : vector<1x32x32xf32> to vector<32x32xf32>
    %cst_69 = arith.constant dense<0.000000e+00> : vector<2x32xf32>
    %123 = tpu.matmul %115, %122, %cst_69 {dimension_numbers = #tpu.dot_dimension_numbers<[1], [0], [0], [1], [0, 0, 1, 1], [], []>} : vector<2x32xf32>, vector<32x32xf32>, vector<2x32xf32> -> vector<2x32xf32>
    %124 = arith.addf %120, %123 : vector<2x32xf32>
    %125 = arith.negf %124 : vector<2x32xf32>
    %126 = math.exp %125 : vector<2x32xf32>
    %cst_70 = arith.constant 1.000000e+00 : f32
    %127 = vector.broadcast %cst_70 : f32 to vector<2x32xf32>
    %128 = arith.addf %127, %126 : vector<2x32xf32>
    %129 = arith.divf %127, %128 : vector<2x32xf32>
    %130 = vector.extract_strided_slice %118 {offsets = [1, 0, 0], sizes = [1, 2, 32], strides = [1, 1, 1]} : vector<4x2x32xf32> to vector<1x2x32xf32>
    %131 = vector.shape_cast %130 : vector<1x2x32xf32> to vector<2x32xf32>
    %c1_71 = arith.constant 1 : index
    %c0_72 = arith.constant 0 : index
    %c0_73 = arith.constant 0 : index
    %132 = vector.load %arg2[%c1_71, %c0_72, %c0_73] : memref<4x32x32xf32, #tpu.memory_space<vmem>>, vector<1x32x32xf32>
    %133 = vector.shape_cast %132 : vector<1x32x32xf32> to vector<32x32xf32>
    %cst_74 = arith.constant dense<0.000000e+00> : vector<2x32xf32>
    %134 = tpu.matmul %115, %133, %cst_74 {dimension_numbers = #tpu.dot_dimension_numbers<[1], [0], [0], [1], [0, 0, 1, 1], [], []>} : vector<2x32xf32>, vector<32x32xf32>, vector<2x32xf32> -> vector<2x32xf32>
    %135 = arith.addf %131, %134 : vector<2x32xf32>
    %136 = arith.negf %135 : vector<2x32xf32>
    %137 = math.exp %136 : vector<2x32xf32>
    %cst_75 = arith.constant 1.000000e+00 : f32
    %138 = vector.broadcast %cst_75 : f32 to vector<2x32xf32>
    %139 = arith.addf %138, %137 : vector<2x32xf32>
    %140 = arith.divf %138, %139 : vector<2x32xf32>
    %141 = vector.extract_strided_slice %118 {offsets = [2, 0, 0], sizes = [1, 2, 32], strides = [1, 1, 1]} : vector<4x2x32xf32> to vector<1x2x32xf32>
    %142 = vector.shape_cast %141 : vector<1x2x32xf32> to vector<2x32xf32>
    %c2_76 = arith.constant 2 : index
    %c0_77 = arith.constant 0 : index
    %c0_78 = arith.constant 0 : index
    %143 = vector.load %arg2[%c2_76, %c0_77, %c0_78] : memref<4x32x32xf32, #tpu.memory_space<vmem>>, vector<1x32x32xf32>
    %144 = vector.shape_cast %143 : vector<1x32x32xf32> to vector<32x32xf32>
    %cst_79 = arith.constant dense<0.000000e+00> : vector<2x32xf32>
    %145 = tpu.matmul %115, %144, %cst_79 {dimension_numbers = #tpu.dot_dimension_numbers<[1], [0], [0], [1], [0, 0, 1, 1], [], []>} : vector<2x32xf32>, vector<32x32xf32>, vector<2x32xf32> -> vector<2x32xf32>
    %146 = arith.addf %142, %145 : vector<2x32xf32>
    %147 = math.tanh %146 : vector<2x32xf32>
    %148 = vector.extract_strided_slice %118 {offsets = [3, 0, 0], sizes = [1, 2, 32], strides = [1, 1, 1]} : vector<4x2x32xf32> to vector<1x2x32xf32>
    %149 = vector.shape_cast %148 : vector<1x2x32xf32> to vector<2x32xf32>
    %c3_80 = arith.constant 3 : index
    %c0_81 = arith.constant 0 : index
    %c0_82 = arith.constant 0 : index
    %150 = vector.load %arg2[%c3_80, %c0_81, %c0_82] : memref<4x32x32xf32, #tpu.memory_space<vmem>>, vector<1x32x32xf32>
    %151 = vector.shape_cast %150 : vector<1x32x32xf32> to vector<32x32xf32>
    %cst_83 = arith.constant dense<0.000000e+00> : vector<2x32xf32>
    %152 = tpu.matmul %115, %151, %cst_83 {dimension_numbers = #tpu.dot_dimension_numbers<[1], [0], [0], [1], [0, 0, 1, 1], [], []>} : vector<2x32xf32>, vector<32x32xf32>, vector<2x32xf32> -> vector<2x32xf32>
    %153 = arith.addf %149, %152 : vector<2x32xf32>
    %154 = arith.negf %153 : vector<2x32xf32>
    %155 = math.exp %154 : vector<2x32xf32>
    %cst_84 = arith.constant 1.000000e+00 : f32
    %156 = vector.broadcast %cst_84 : f32 to vector<2x32xf32>
    %157 = arith.addf %156, %155 : vector<2x32xf32>
    %158 = arith.divf %156, %157 : vector<2x32xf32>
    %c0_85 = arith.constant 0 : index
    %c0_86 = arith.constant 0 : index
    %159 = vector.load %arg5[%c0_85, %c0_86] : memref<2x32xf32, #tpu.memory_space<vmem>>, vector<2x32xf32>
    %160 = arith.mulf %140, %159 : vector<2x32xf32>
    %161 = arith.mulf %129, %147 : vector<2x32xf32>
    %162 = arith.addf %160, %161 : vector<2x32xf32>
    %163 = math.tanh %162 : vector<2x32xf32>
    %164 = arith.mulf %158, %163 : vector<2x32xf32>
    %c0_87 = arith.constant 0 : index
    %c0_88 = arith.constant 0 : index
    %165 = vector.load %arg5[%c0_87, %c0_88] : memref<2x32xf32, #tpu.memory_space<vmem>>, vector<2x32xf32>
    tpu.vector_store %arg5[%c0_87, %c0_88], %162 {strides = array<i32>} : memref<2x32xf32, #tpu.memory_space<vmem>>, vector<2x32xf32>,
    %c0_89 = arith.constant 0 : index
    %c0_90 = arith.constant 0 : index
    %166 = vector.load %arg4[%c0_89, %c0_90] : memref<2x32xf32, #tpu.memory_space<vmem>>, vector<2x32xf32>
    tpu.vector_store %arg4[%c0_89, %c0_90], %164 {strides = array<i32>} : memref<2x32xf32, #tpu.memory_space<vmem>>, vector<2x32xf32>,
    %167 = arith.index_cast %c2_i32 : i32 to index
    %c0_91 = arith.constant 0 : index
    %c0_92 = arith.constant 0 : index
    %168 = vector.load %arg3[%167, %c0_91, %c0_92] : memref<8x2x32xf32, #tpu.memory_space<vmem>>, vector<1x2x32xf32>
    %169 = vector.shape_cast %168 : vector<1x2x32xf32> to vector<2x32xf32>
    %170 = vector.shape_cast %164 : vector<2x32xf32> to vector<1x2x32xf32>
    tpu.vector_store %arg3[%167, %c0_91, %c0_92], %170 {strides = array<i32>} : memref<8x2x32xf32, #tpu.memory_space<vmem>>, vector<1x2x32xf32>,
    %c3_i32 = arith.constant 3 : i32
    %c0_93 = arith.constant 0 : index
    %c0_94 = arith.constant 0 : index
    %171 = vector.load %arg4[%c0_93, %c0_94] : memref<2x32xf32, #tpu.memory_space<vmem>>, vector<2x32xf32>
    %172 = arith.index_cast %c3_i32 : i32 to index
    %c0_95 = arith.constant 0 : index
    %c0_96 = arith.constant 0 : index
    %c0_97 = arith.constant 0 : index
    %173 = vector.load %arg1[%172, %c0_95, %c0_96, %c0_97] : memref<8x4x2x32xf32, #tpu.memory_space<vmem>>, vector<1x4x2x32xf32>
    %174 = vector.shape_cast %173 : vector<1x4x2x32xf32> to vector<4x2x32xf32>
    %175 = vector.extract_strided_slice %174 {offsets = [0, 0, 0], sizes = [1, 2, 32], strides = [1, 1, 1]} : vector<4x2x32xf32> to vector<1x2x32xf32>
    %176 = vector.shape_cast %175 : vector<1x2x32xf32> to vector<2x32xf32>
    %c0_98 = arith.constant 0 : index
    %c0_99 = arith.constant 0 : index
    %c0_100 = arith.constant 0 : index
    %177 = vector.load %arg2[%c0_98, %c0_99, %c0_100] : memref<4x32x32xf32, #tpu.memory_space<vmem>>, vector<1x32x32xf32>
    %178 = vector.shape_cast %177 : vector<1x32x32xf32> to vector<32x32xf32>
    %cst_101 = arith.constant dense<0.000000e+00> : vector<2x32xf32>
    %179 = tpu.matmul %171, %178, %cst_101 {dimension_numbers = #tpu.dot_dimension_numbers<[1], [0], [0], [1], [0, 0, 1, 1], [], []>} : vector<2x32xf32>, vector<32x32xf32>, vector<2x32xf32> -> vector<2x32xf32>
    %180 = arith.addf %176, %179 : vector<2x32xf32>
    %181 = arith.negf %180 : vector<2x32xf32>
    %182 = math.exp %181 : vector<2x32xf32>
    %cst_102 = arith.constant 1.000000e+00 : f32
    %183 = vector.broadcast %cst_102 : f32 to vector<2x32xf32>
    %184 = arith.addf %183, %182 : vector<2x32xf32>
    %185 = arith.divf %183, %184 : vector<2x32xf32>
    %186 = vector.extract_strided_slice %174 {offsets = [1, 0, 0], sizes = [1, 2, 32], strides = [1, 1, 1]} : vector<4x2x32xf32> to vector<1x2x32xf32>
    %187 = vector.shape_cast %186 : vector<1x2x32xf32> to vector<2x32xf32>
    %c1_103 = arith.constant 1 : index
    %c0_104 = arith.constant 0 : index
    %c0_105 = arith.constant 0 : index
    %188 = vector.load %arg2[%c1_103, %c0_104, %c0_105] : memref<4x32x32xf32, #tpu.memory_space<vmem>>, vector<1x32x32xf32>
    %189 = vector.shape_cast %188 : vector<1x32x32xf32> to vector<32x32xf32>
    %cst_106 = arith.constant dense<0.000000e+00> : vector<2x32xf32>
    %190 = tpu.matmul %171, %189, %cst_106 {dimension_numbers = #tpu.dot_dimension_numbers<[1], [0], [0], [1], [0, 0, 1, 1], [], []>} : vector<2x32xf32>, vector<32x32xf32>, vector<2x32xf32> -> vector<2x32xf32>
    %191 = arith.addf %187, %190 : vector<2x32xf32>
    %192 = arith.negf %191 : vector<2x32xf32>
    %193 = math.exp %192 : vector<2x32xf32>
    %cst_107 = arith.constant 1.000000e+00 : f32
    %194 = vector.broadcast %cst_107 : f32 to vector<2x32xf32>
    %195 = arith.addf %194, %193 : vector<2x32xf32>
    %196 = arith.divf %194, %195 : vector<2x32xf32>
    %197 = vector.extract_strided_slice %174 {offsets = [2, 0, 0], sizes = [1, 2, 32], strides = [1, 1, 1]} : vector<4x2x32xf32> to vector<1x2x32xf32>
    %198 = vector.shape_cast %197 : vector<1x2x32xf32> to vector<2x32xf32>
    %c2_108 = arith.constant 2 : index
    %c0_109 = arith.constant 0 : index
    %c0_110 = arith.constant 0 : index
    %199 = vector.load %arg2[%c2_108, %c0_109, %c0_110] : memref<4x32x32xf32, #tpu.memory_space<vmem>>, vector<1x32x32xf32>
    %200 = vector.shape_cast %199 : vector<1x32x32xf32> to vector<32x32xf32>
    %cst_111 = arith.constant dense<0.000000e+00> : vector<2x32xf32>
    %201 = tpu.matmul %171, %200, %cst_111 {dimension_numbers = #tpu.dot_dimension_numbers<[1], [0], [0], [1], [0, 0, 1, 1], [], []>} : vector<2x32xf32>, vector<32x32xf32>, vector<2x32xf32> -> vector<2x32xf32>
    %202 = arith.addf %198, %201 : vector<2x32xf32>
    %203 = math.tanh %202 : vector<2x32xf32>
    %204 = vector.extract_strided_slice %174 {offsets = [3, 0, 0], sizes = [1, 2, 32], strides = [1, 1, 1]} : vector<4x2x32xf32> to vector<1x2x32xf32>
    %205 = vector.shape_cast %204 : vector<1x2x32xf32> to vector<2x32xf32>
    %c3_112 = arith.constant 3 : index
    %c0_113 = arith.constant 0 : index
    %c0_114 = arith.constant 0 : index
    %206 = vector.load %arg2[%c3_112, %c0_113, %c0_114] : memref<4x32x32xf32, #tpu.memory_space<vmem>>, vector<1x32x32xf32>
    %207 = vector.shape_cast %206 : vector<1x32x32xf32> to vector<32x32xf32>
    %cst_115 = arith.constant dense<0.000000e+00> : vector<2x32xf32>
    %208 = tpu.matmul %171, %207, %cst_115 {dimension_numbers = #tpu.dot_dimension_numbers<[1], [0], [0], [1], [0, 0, 1, 1], [], []>} : vector<2x32xf32>, vector<32x32xf32>, vector<2x32xf32> -> vector<2x32xf32>
    %209 = arith.addf %205, %208 : vector<2x32xf32>
    %210 = arith.negf %209 : vector<2x32xf32>
    %211 = math.exp %210 : vector<2x32xf32>
    %cst_116 = arith.constant 1.000000e+00 : f32
    %212 = vector.broadcast %cst_116 : f32 to vector<2x32xf32>
    %213 = arith.addf %212, %211 : vector<2x32xf32>
    %214 = arith.divf %212, %213 : vector<2x32xf32>
    %c0_117 = arith.constant 0 : index
    %c0_118 = arith.constant 0 : index
    %215 = vector.load %arg5[%c0_117, %c0_118] : memref<2x32xf32, #tpu.memory_space<vmem>>, vector<2x32xf32>
    %216 = arith.mulf %196, %215 : vector<2x32xf32>
    %217 = arith.mulf %185, %203 : vector<2x32xf32>
    %218 = arith.addf %216, %217 : vector<2x32xf32>
    %219 = math.tanh %218 : vector<2x32xf32>
    %220 = arith.mulf %214, %219 : vector<2x32xf32>
    %c0_119 = arith.constant 0 : index
    %c0_120 = arith.constant 0 : index
    %221 = vector.load %arg5[%c0_119, %c0_120] : memref<2x32xf32, #tpu.memory_space<vmem>>, vector<2x32xf32>
    tpu.vector_store %arg5[%c0_119, %c0_120], %218 {strides = array<i32>} : memref<2x32xf32, #tpu.memory_space<vmem>>, vector<2x32xf32>,
    %c0_121 = arith.constant 0 : index
    %c0_122 = arith.constant 0 : index
    %222 = vector.load %arg4[%c0_121, %c0_122] : memref<2x32xf32, #tpu.memory_space<vmem>>, vector<2x32xf32>
    tpu.vector_store %arg4[%c0_121, %c0_122], %220 {strides = array<i32>} : memref<2x32xf32, #tpu.memory_space<vmem>>, vector<2x32xf32>,
    %223 = arith.index_cast %c3_i32 : i32 to index
    %c0_123 = arith.constant 0 : index
    %c0_124 = arith.constant 0 : index
    %224 = vector.load %arg3[%223, %c0_123, %c0_124] : memref<8x2x32xf32, #tpu.memory_space<vmem>>, vector<1x2x32xf32>
    %225 = vector.shape_cast %224 : vector<1x2x32xf32> to vector<2x32xf32>
    %226 = vector.shape_cast %220 : vector<2x32xf32> to vector<1x2x32xf32>
    tpu.vector_store %arg3[%223, %c0_123, %c0_124], %226 {strides = array<i32>} : memref<8x2x32xf32, #tpu.memory_space<vmem>>, vector<1x2x32xf32>,
    %c4_i32 = arith.constant 4 : i32
    %c0_125 = arith.constant 0 : index
    %c0_126 = arith.constant 0 : index
    %227 = vector.load %arg4[%c0_125, %c0_126] : memref<2x32xf32, #tpu.memory_space<vmem>>, vector<2x32xf32>
    %228 = arith.index_cast %c4_i32 : i32 to index
    %c0_127 = arith.constant 0 : index
    %c0_128 = arith.constant 0 : index
    %c0_129 = arith.constant 0 : index
    %229 = vector.load %arg1[%228, %c0_127, %c0_128, %c0_129] : memref<8x4x2x32xf32, #tpu.memory_space<vmem>>, vector<1x4x2x32xf32>
    %230 = vector.shape_cast %229 : vector<1x4x2x32xf32> to vector<4x2x32xf32>
    %231 = vector.extract_strided_slice %230 {offsets = [0, 0, 0], sizes = [1, 2, 32], strides = [1, 1, 1]} : vector<4x2x32xf32> to vector<1x2x32xf32>
    %232 = vector.shape_cast %231 : vector<1x2x32xf32> to vector<2x32xf32>
    %c0_130 = arith.constant 0 : index
    %c0_131 = arith.constant 0 : index
    %c0_132 = arith.constant 0 : index
    %233 = vector.load %arg2[%c0_130, %c0_131, %c0_132] : memref<4x32x32xf32, #tpu.memory_space<vmem>>, vector<1x32x32xf32>
    %234 = vector.shape_cast %233 : vector<1x32x32xf32> to vector<32x32xf32>
    %cst_133 = arith.constant dense<0.000000e+00> : vector<2x32xf32>
    %235 = tpu.matmul %227, %234, %cst_133 {dimension_numbers = #tpu.dot_dimension_numbers<[1], [0], [0], [1], [0, 0, 1, 1], [], []>} : vector<2x32xf32>, vector<32x32xf32>, vector<2x32xf32> -> vector<2x32xf32>
    %236 = arith.addf %232, %235 : vector<2x32xf32>
    %237 = arith.negf %236 : vector<2x32xf32>
    %238 = math.exp %237 : vector<2x32xf32>
    %cst_134 = arith.constant 1.000000e+00 : f32
    %239 = vector.broadcast %cst_134 : f32 to vector<2x32xf32>
    %240 = arith.addf %239, %238 : vector<2x32xf32>
    %241 = arith.divf %239, %240 : vector<2x32xf32>
    %242 = vector.extract_strided_slice %230 {offsets = [1, 0, 0], sizes = [1, 2, 32], strides = [1, 1, 1]} : vector<4x2x32xf32> to vector<1x2x32xf32>
    %243 = vector.shape_cast %242 : vector<1x2x32xf32> to vector<2x32xf32>
    %c1_135 = arith.constant 1 : index
    %c0_136 = arith.constant 0 : index
    %c0_137 = arith.constant 0 : index
    %244 = vector.load %arg2[%c1_135, %c0_136, %c0_137] : memref<4x32x32xf32, #tpu.memory_space<vmem>>, vector<1x32x32xf32>
    %245 = vector.shape_cast %244 : vector<1x32x32xf32> to vector<32x32xf32>
    %cst_138 = arith.constant dense<0.000000e+00> : vector<2x32xf32>
    %246 = tpu.matmul %227, %245, %cst_138 {dimension_numbers = #tpu.dot_dimension_numbers<[1], [0], [0], [1], [0, 0, 1, 1], [], []>} : vector<2x32xf32>, vector<32x32xf32>, vector<2x32xf32> -> vector<2x32xf32>
    %247 = arith.addf %243, %246 : vector<2x32xf32>
    %248 = arith.negf %247 : vector<2x32xf32>
    %249 = math.exp %248 : vector<2x32xf32>
    %cst_139 = arith.constant 1.000000e+00 : f32
    %250 = vector.broadcast %cst_139 : f32 to vector<2x32xf32>
    %251 = arith.addf %250, %249 : vector<2x32xf32>
    %252 = arith.divf %250, %251 : vector<2x32xf32>
    %253 = vector.extract_strided_slice %230 {offsets = [2, 0, 0], sizes = [1, 2, 32], strides = [1, 1, 1]} : vector<4x2x32xf32> to vector<1x2x32xf32>
    %254 = vector.shape_cast %253 : vector<1x2x32xf32> to vector<2x32xf32>
    %c2_140 = arith.constant 2 : index
    %c0_141 = arith.constant 0 : index
    %c0_142 = arith.constant 0 : index
    %255 = vector.load %arg2[%c2_140, %c0_141, %c0_142] : memref<4x32x32xf32, #tpu.memory_space<vmem>>, vector<1x32x32xf32>
    %256 = vector.shape_cast %255 : vector<1x32x32xf32> to vector<32x32xf32>
    %cst_143 = arith.constant dense<0.000000e+00> : vector<2x32xf32>
    %257 = tpu.matmul %227, %256, %cst_143 {dimension_numbers = #tpu.dot_dimension_numbers<[1], [0], [0], [1], [0, 0, 1, 1], [], []>} : vector<2x32xf32>, vector<32x32xf32>, vector<2x32xf32> -> vector<2x32xf32>
    %258 = arith.addf %254, %257 : vector<2x32xf32>
    %259 = math.tanh %258 : vector<2x32xf32>
    %260 = vector.extract_strided_slice %230 {offsets = [3, 0, 0], sizes = [1, 2, 32], strides = [1, 1, 1]} : vector<4x2x32xf32> to vector<1x2x32xf32>
    %261 = vector.shape_cast %260 : vector<1x2x32xf32> to vector<2x32xf32>
    %c3_144 = arith.constant 3 : index
    %c0_145 = arith.constant 0 : index
    %c0_146 = arith.constant 0 : index
    %262 = vector.load %arg2[%c3_144, %c0_145, %c0_146] : memref<4x32x32xf32, #tpu.memory_space<vmem>>, vector<1x32x32xf32>
    %263 = vector.shape_cast %262 : vector<1x32x32xf32> to vector<32x32xf32>
    %cst_147 = arith.constant dense<0.000000e+00> : vector<2x32xf32>
    %264 = tpu.matmul %227, %263, %cst_147 {dimension_numbers = #tpu.dot_dimension_numbers<[1], [0], [0], [1], [0, 0, 1, 1], [], []>} : vector<2x32xf32>, vector<32x32xf32>, vector<2x32xf32> -> vector<2x32xf32>
    %265 = arith.addf %261, %264 : vector<2x32xf32>
    %266 = arith.negf %265 : vector<2x32xf32>
    %267 = math.exp %266 : vector<2x32xf32>
    %cst_148 = arith.constant 1.000000e+00 : f32
    %268 = vector.broadcast %cst_148 : f32 to vector<2x32xf32>
    %269 = arith.addf %268, %267 : vector<2x32xf32>
    %270 = arith.divf %268, %269 : vector<2x32xf32>
    %c0_149 = arith.constant 0 : index
    %c0_150 = arith.constant 0 : index
    %271 = vector.load %arg5[%c0_149, %c0_150] : memref<2x32xf32, #tpu.memory_space<vmem>>, vector<2x32xf32>
    %272 = arith.mulf %252, %271 : vector<2x32xf32>
    %273 = arith.mulf %241, %259 : vector<2x32xf32>
    %274 = arith.addf %272, %273 : vector<2x32xf32>
    %275 = math.tanh %274 : vector<2x32xf32>
    %276 = arith.mulf %270, %275 : vector<2x32xf32>
    %c0_151 = arith.constant 0 : index
    %c0_152 = arith.constant 0 : index
    %277 = vector.load %arg5[%c0_151, %c0_152] : memref<2x32xf32, #tpu.memory_space<vmem>>, vector<2x32xf32>
    tpu.vector_store %arg5[%c0_151, %c0_152], %274 {strides = array<i32>} : memref<2x32xf32, #tpu.memory_space<vmem>>, vector<2x32xf32>,
    %c0_153 = arith.constant 0 : index
    %c0_154 = arith.constant 0 : index
    %278 = vector.load %arg4[%c0_153, %c0_154] : memref<2x32xf32, #tpu.memory_space<vmem>>, vector<2x32xf32>
    tpu.vector_store %arg4[%c0_153, %c0_154], %276 {strides = array<i32>} : memref<2x32xf32, #tpu.memory_space<vmem>>, vector<2x32xf32>,
    %279 = arith.index_cast %c4_i32 : i32 to index
    %c0_155 = arith.constant 0 : index
    %c0_156 = arith.constant 0 : index
    %280 = vector.load %arg3[%279, %c0_155, %c0_156] : memref<8x2x32xf32, #tpu.memory_space<vmem>>, vector<1x2x32xf32>
    %281 = vector.shape_cast %280 : vector<1x2x32xf32> to vector<2x32xf32>
    %282 = vector.shape_cast %276 : vector<2x32xf32> to vector<1x2x32xf32>
    tpu.vector_store %arg3[%279, %c0_155, %c0_156], %282 {strides = array<i32>} : memref<8x2x32xf32, #tpu.memory_space<vmem>>, vector<1x2x32xf32>,
    %c5_i32 = arith.constant 5 : i32
    %c0_157 = arith.constant 0 : index
    %c0_158 = arith.constant 0 : index
    %283 = vector.load %arg4[%c0_157, %c0_158] : memref<2x32xf32, #tpu.memory_space<vmem>>, vector<2x32xf32>
    %284 = arith.index_cast %c5_i32 : i32 to index
    %c0_159 = arith.constant 0 : index
    %c0_160 = arith.constant 0 : index
    %c0_161 = arith.constant 0 : index
    %285 = vector.load %arg1[%284, %c0_159, %c0_160, %c0_161] : memref<8x4x2x32xf32, #tpu.memory_space<vmem>>, vector<1x4x2x32xf32>
    %286 = vector.shape_cast %285 : vector<1x4x2x32xf32> to vector<4x2x32xf32>
    %287 = vector.extract_strided_slice %286 {offsets = [0, 0, 0], sizes = [1, 2, 32], strides = [1, 1, 1]} : vector<4x2x32xf32> to vector<1x2x32xf32>
    %288 = vector.shape_cast %287 : vector<1x2x32xf32> to vector<2x32xf32>
    %c0_162 = arith.constant 0 : index
    %c0_163 = arith.constant 0 : index
    %c0_164 = arith.constant 0 : index
    %289 = vector.load %arg2[%c0_162, %c0_163, %c0_164] : memref<4x32x32xf32, #tpu.memory_space<vmem>>, vector<1x32x32xf32>
    %290 = vector.shape_cast %289 : vector<1x32x32xf32> to vector<32x32xf32>
    %cst_165 = arith.constant dense<0.000000e+00> : vector<2x32xf32>
    %291 = tpu.matmul %283, %290, %cst_165 {dimension_numbers = #tpu.dot_dimension_numbers<[1], [0], [0], [1], [0, 0, 1, 1], [], []>} : vector<2x32xf32>, vector<32x32xf32>, vector<2x32xf32> -> vector<2x32xf32>
    %292 = arith.addf %288, %291 : vector<2x32xf32>
    %293 = arith.negf %292 : vector<2x32xf32>
    %294 = math.exp %293 : vector<2x32xf32>
    %cst_166 = arith.constant 1.000000e+00 : f32
    %295 = vector.broadcast %cst_166 : f32 to vector<2x32xf32>
    %296 = arith.addf %295, %294 : vector<2x32xf32>
    %297 = arith.divf %295, %296 : vector<2x32xf32>
    %298 = vector.extract_strided_slice %286 {offsets = [1, 0, 0], sizes = [1, 2, 32], strides = [1, 1, 1]} : vector<4x2x32xf32> to vector<1x2x32xf32>
    %299 = vector.shape_cast %298 : vector<1x2x32xf32> to vector<2x32xf32>
    %c1_167 = arith.constant 1 : index
    %c0_168 = arith.constant 0 : index
    %c0_169 = arith.constant 0 : index
    %300 = vector.load %arg2[%c1_167, %c0_168, %c0_169] : memref<4x32x32xf32, #tpu.memory_space<vmem>>, vector<1x32x32xf32>
    %301 = vector.shape_cast %300 : vector<1x32x32xf32> to vector<32x32xf32>
    %cst_170 = arith.constant dense<0.000000e+00> : vector<2x32xf32>
    %302 = tpu.matmul %283, %301, %cst_170 {dimension_numbers = #tpu.dot_dimension_numbers<[1], [0], [0], [1], [0, 0, 1, 1], [], []>} : vector<2x32xf32>, vector<32x32xf32>, vector<2x32xf32> -> vector<2x32xf32>
    %303 = arith.addf %299, %302 : vector<2x32xf32>
    %304 = arith.negf %303 : vector<2x32xf32>
    %305 = math.exp %304 : vector<2x32xf32>
    %cst_171 = arith.constant 1.000000e+00 : f32
    %306 = vector.broadcast %cst_171 : f32 to vector<2x32xf32>
    %307 = arith.addf %306, %305 : vector<2x32xf32>
    %308 = arith.divf %306, %307 : vector<2x32xf32>
    %309 = vector.extract_strided_slice %286 {offsets = [2, 0, 0], sizes = [1, 2, 32], strides = [1, 1, 1]} : vector<4x2x32xf32> to vector<1x2x32xf32>
    %310 = vector.shape_cast %309 : vector<1x2x32xf32> to vector<2x32xf32>
    %c2_172 = arith.constant 2 : index
    %c0_173 = arith.constant 0 : index
    %c0_174 = arith.constant 0 : index
    %311 = vector.load %arg2[%c2_172, %c0_173, %c0_174] : memref<4x32x32xf32, #tpu.memory_space<vmem>>, vector<1x32x32xf32>
    %312 = vector.shape_cast %311 : vector<1x32x32xf32> to vector<32x32xf32>
    %cst_175 = arith.constant dense<0.000000e+00> : vector<2x32xf32>
    %313 = tpu.matmul %283, %312, %cst_175 {dimension_numbers = #tpu.dot_dimension_numbers<[1], [0], [0], [1], [0, 0, 1, 1], [], []>} : vector<2x32xf32>, vector<32x32xf32>, vector<2x32xf32> -> vector<2x32xf32>
    %314 = arith.addf %310, %313 : vector<2x32xf32>
    %315 = math.tanh %314 : vector<2x32xf32>
    %316 = vector.extract_strided_slice %286 {offsets = [3, 0, 0], sizes = [1, 2, 32], strides = [1, 1, 1]} : vector<4x2x32xf32> to vector<1x2x32xf32>
    %317 = vector.shape_cast %316 : vector<1x2x32xf32> to vector<2x32xf32>
    %c3_176 = arith.constant 3 : index
    %c0_177 = arith.constant 0 : index
    %c0_178 = arith.constant 0 : index
    %318 = vector.load %arg2[%c3_176, %c0_177, %c0_178] : memref<4x32x32xf32, #tpu.memory_space<vmem>>, vector<1x32x32xf32>
    %319 = vector.shape_cast %318 : vector<1x32x32xf32> to vector<32x32xf32>
    %cst_179 = arith.constant dense<0.000000e+00> : vector<2x32xf32>
    %320 = tpu.matmul %283, %319, %cst_179 {dimension_numbers = #tpu.dot_dimension_numbers<[1], [0], [0], [1], [0, 0, 1, 1], [], []>} : vector<2x32xf32>, vector<32x32xf32>, vector<2x32xf32> -> vector<2x32xf32>
    %321 = arith.addf %317, %320 : vector<2x32xf32>
    %322 = arith.negf %321 : vector<2x32xf32>
    %323 = math.exp %322 : vector<2x32xf32>
    %cst_180 = arith.constant 1.000000e+00 : f32
    %324 = vector.broadcast %cst_180 : f32 to vector<2x32xf32>
    %325 = arith.addf %324, %323 : vector<2x32xf32>
    %326 = arith.divf %324, %325 : vector<2x32xf32>
    %c0_181 = arith.constant 0 : index
    %c0_182 = arith.constant 0 : index
    %327 = vector.load %arg5[%c0_181, %c0_182] : memref<2x32xf32, #tpu.memory_space<vmem>>, vector<2x32xf32>
    %328 = arith.mulf %308, %327 : vector<2x32xf32>
    %329 = arith.mulf %297, %315 : vector<2x32xf32>
    %330 = arith.addf %328, %329 : vector<2x32xf32>
    %331 = math.tanh %330 : vector<2x32xf32>
    %332 = arith.mulf %326, %331 : vector<2x32xf32>
    %c0_183 = arith.constant 0 : index
    %c0_184 = arith.constant 0 : index
    %333 = vector.load %arg5[%c0_183, %c0_184] : memref<2x32xf32, #tpu.memory_space<vmem>>, vector<2x32xf32>
    tpu.vector_store %arg5[%c0_183, %c0_184], %330 {strides = array<i32>} : memref<2x32xf32, #tpu.memory_space<vmem>>, vector<2x32xf32>,
    %c0_185 = arith.constant 0 : index
    %c0_186 = arith.constant 0 : index
    %334 = vector.load %arg4[%c0_185, %c0_186] : memref<2x32xf32, #tpu.memory_space<vmem>>, vector<2x32xf32>
    tpu.vector_store %arg4[%c0_185, %c0_186], %332 {strides = array<i32>} : memref<2x32xf32, #tpu.memory_space<vmem>>, vector<2x32xf32>,
    %335 = arith.index_cast %c5_i32 : i32 to index
    %c0_187 = arith.constant 0 : index
    %c0_188 = arith.constant 0 : index
    %336 = vector.load %arg3[%335, %c0_187, %c0_188] : memref<8x2x32xf32, #tpu.memory_space<vmem>>, vector<1x2x32xf32>
    %337 = vector.shape_cast %336 : vector<1x2x32xf32> to vector<2x32xf32>
    %338 = vector.shape_cast %332 : vector<2x32xf32> to vector<1x2x32xf32>
    tpu.vector_store %arg3[%335, %c0_187, %c0_188], %338 {strides = array<i32>} : memref<8x2x32xf32, #tpu.memory_space<vmem>>, vector<1x2x32xf32>,
    %c6_i32 = arith.constant 6 : i32
    %c0_189 = arith.constant 0 : index
    %c0_190 = arith.constant 0 : index
    %339 = vector.load %arg4[%c0_189, %c0_190] : memref<2x32xf32, #tpu.memory_space<vmem>>, vector<2x32xf32>
    %340 = arith.index_cast %c6_i32 : i32 to index
    %c0_191 = arith.constant 0 : index
    %c0_192 = arith.constant 0 : index
    %c0_193 = arith.constant 0 : index
    %341 = vector.load %arg1[%340, %c0_191, %c0_192, %c0_193] : memref<8x4x2x32xf32, #tpu.memory_space<vmem>>, vector<1x4x2x32xf32>
    %342 = vector.shape_cast %341 : vector<1x4x2x32xf32> to vector<4x2x32xf32>
    %343 = vector.extract_strided_slice %342 {offsets = [0, 0, 0], sizes = [1, 2, 32], strides = [1, 1, 1]} : vector<4x2x32xf32> to vector<1x2x32xf32>
    %344 = vector.shape_cast %343 : vector<1x2x32xf32> to vector<2x32xf32>
    %c0_194 = arith.constant 0 : index
    %c0_195 = arith.constant 0 : index
    %c0_196 = arith.constant 0 : index
    %345 = vector.load %arg2[%c0_194, %c0_195, %c0_196] : memref<4x32x32xf32, #tpu.memory_space<vmem>>, vector<1x32x32xf32>
    %346 = vector.shape_cast %345 : vector<1x32x32xf32> to vector<32x32xf32>
    %cst_197 = arith.constant dense<0.000000e+00> : vector<2x32xf32>
    %347 = tpu.matmul %339, %346, %cst_197 {dimension_numbers = #tpu.dot_dimension_numbers<[1], [0], [0], [1], [0, 0, 1, 1], [], []>} : vector<2x32xf32>, vector<32x32xf32>, vector<2x32xf32> -> vector<2x32xf32>
    %348 = arith.addf %344, %347 : vector<2x32xf32>
    %349 = arith.negf %348 : vector<2x32xf32>
    %350 = math.exp %349 : vector<2x32xf32>
    %cst_198 = arith.constant 1.000000e+00 : f32
    %351 = vector.broadcast %cst_198 : f32 to vector<2x32xf32>
    %352 = arith.addf %351, %350 : vector<2x32xf32>
    %353 = arith.divf %351, %352 : vector<2x32xf32>
    %354 = vector.extract_strided_slice %342 {offsets = [1, 0, 0], sizes = [1, 2, 32], strides = [1, 1, 1]} : vector<4x2x32xf32> to vector<1x2x32xf32>
    %355 = vector.shape_cast %354 : vector<1x2x32xf32> to vector<2x32xf32>
    %c1_199 = arith.constant 1 : index
    %c0_200 = arith.constant 0 : index
    %c0_201 = arith.constant 0 : index
    %356 = vector.load %arg2[%c1_199, %c0_200, %c0_201] : memref<4x32x32xf32, #tpu.memory_space<vmem>>, vector<1x32x32xf32>
    %357 = vector.shape_cast %356 : vector<1x32x32xf32> to vector<32x32xf32>
    %cst_202 = arith.constant dense<0.000000e+00> : vector<2x32xf32>
    %358 = tpu.matmul %339, %357, %cst_202 {dimension_numbers = #tpu.dot_dimension_numbers<[1], [0], [0], [1], [0, 0, 1, 1], [], []>} : vector<2x32xf32>, vector<32x32xf32>, vector<2x32xf32> -> vector<2x32xf32>
    %359 = arith.addf %355, %358 : vector<2x32xf32>
    %360 = arith.negf %359 : vector<2x32xf32>
    %361 = math.exp %360 : vector<2x32xf32>
    %cst_203 = arith.constant 1.000000e+00 : f32
    %362 = vector.broadcast %cst_203 : f32 to vector<2x32xf32>
    %363 = arith.addf %362, %361 : vector<2x32xf32>
    %364 = arith.divf %362, %363 : vector<2x32xf32>
    %365 = vector.extract_strided_slice %342 {offsets = [2, 0, 0], sizes = [1, 2, 32], strides = [1, 1, 1]} : vector<4x2x32xf32> to vector<1x2x32xf32>
    %366 = vector.shape_cast %365 : vector<1x2x32xf32> to vector<2x32xf32>
    %c2_204 = arith.constant 2 : index
    %c0_205 = arith.constant 0 : index
    %c0_206 = arith.constant 0 : index
    %367 = vector.load %arg2[%c2_204, %c0_205, %c0_206] : memref<4x32x32xf32, #tpu.memory_space<vmem>>, vector<1x32x32xf32>
    %368 = vector.shape_cast %367 : vector<1x32x32xf32> to vector<32x32xf32>
    %cst_207 = arith.constant dense<0.000000e+00> : vector<2x32xf32>
    %369 = tpu.matmul %339, %368, %cst_207 {dimension_numbers = #tpu.dot_dimension_numbers<[1], [0], [0], [1], [0, 0, 1, 1], [], []>} : vector<2x32xf32>, vector<32x32xf32>, vector<2x32xf32> -> vector<2x32xf32>
    %370 = arith.addf %366, %369 : vector<2x32xf32>
    %371 = math.tanh %370 : vector<2x32xf32>
    %372 = vector.extract_strided_slice %342 {offsets = [3, 0, 0], sizes = [1, 2, 32], strides = [1, 1, 1]} : vector<4x2x32xf32> to vector<1x2x32xf32>
    %373 = vector.shape_cast %372 : vector<1x2x32xf32> to vector<2x32xf32>
    %c3_208 = arith.constant 3 : index
    %c0_209 = arith.constant 0 : index
    %c0_210 = arith.constant 0 : index
    %374 = vector.load %arg2[%c3_208, %c0_209, %c0_210] : memref<4x32x32xf32, #tpu.memory_space<vmem>>, vector<1x32x32xf32>
    %375 = vector.shape_cast %374 : vector<1x32x32xf32> to vector<32x32xf32>
    %cst_211 = arith.constant dense<0.000000e+00> : vector<2x32xf32>
    %376 = tpu.matmul %339, %375, %cst_211 {dimension_numbers = #tpu.dot_dimension_numbers<[1], [0], [0], [1], [0, 0, 1, 1], [], []>} : vector<2x32xf32>, vector<32x32xf32>, vector<2x32xf32> -> vector<2x32xf32>
    %377 = arith.addf %373, %376 : vector<2x32xf32>
    %378 = arith.negf %377 : vector<2x32xf32>
    %379 = math.exp %378 : vector<2x32xf32>
    %cst_212 = arith.constant 1.000000e+00 : f32
    %380 = vector.broadcast %cst_212 : f32 to vector<2x32xf32>
    %381 = arith.addf %380, %379 : vector<2x32xf32>
    %382 = arith.divf %380, %381 : vector<2x32xf32>
    %c0_213 = arith.constant 0 : index
    %c0_214 = arith.constant 0 : index
    %383 = vector.load %arg5[%c0_213, %c0_214] : memref<2x32xf32, #tpu.memory_space<vmem>>, vector<2x32xf32>
    %384 = arith.mulf %364, %383 : vector<2x32xf32>
    %385 = arith.mulf %353, %371 : vector<2x32xf32>
    %386 = arith.addf %384, %385 : vector<2x32xf32>
    %387 = math.tanh %386 : vector<2x32xf32>
    %388 = arith.mulf %382, %387 : vector<2x32xf32>
    %c0_215 = arith.constant 0 : index
    %c0_216 = arith.constant 0 : index
    %389 = vector.load %arg5[%c0_215, %c0_216] : memref<2x32xf32, #tpu.memory_space<vmem>>, vector<2x32xf32>
    tpu.vector_store %arg5[%c0_215, %c0_216], %386 {strides = array<i32>} : memref<2x32xf32, #tpu.memory_space<vmem>>, vector<2x32xf32>,
    %c0_217 = arith.constant 0 : index
    %c0_218 = arith.constant 0 : index
    %390 = vector.load %arg4[%c0_217, %c0_218] : memref<2x32xf32, #tpu.memory_space<vmem>>, vector<2x32xf32>
    tpu.vector_store %arg4[%c0_217, %c0_218], %388 {strides = array<i32>} : memref<2x32xf32, #tpu.memory_space<vmem>>, vector<2x32xf32>,
    %391 = arith.index_cast %c6_i32 : i32 to index
    %c0_219 = arith.constant 0 : index
    %c0_220 = arith.constant 0 : index
    %392 = vector.load %arg3[%391, %c0_219, %c0_220] : memref<8x2x32xf32, #tpu.memory_space<vmem>>, vector<1x2x32xf32>
    %393 = vector.shape_cast %392 : vector<1x2x32xf32> to vector<2x32xf32>
    %394 = vector.shape_cast %388 : vector<2x32xf32> to vector<1x2x32xf32>
    tpu.vector_store %arg3[%391, %c0_219, %c0_220], %394 {strides = array<i32>} : memref<8x2x32xf32, #tpu.memory_space<vmem>>, vector<1x2x32xf32>,
    %c7_i32 = arith.constant 7 : i32
    %c0_221 = arith.constant 0 : index
    %c0_222 = arith.constant 0 : index
    %395 = vector.load %arg4[%c0_221, %c0_222] : memref<2x32xf32, #tpu.memory_space<vmem>>, vector<2x32xf32>
    %396 = arith.index_cast %c7_i32 : i32 to index
    %c0_223 = arith.constant 0 : index
    %c0_224 = arith.constant 0 : index
    %c0_225 = arith.constant 0 : index
    %397 = vector.load %arg1[%396, %c0_223, %c0_224, %c0_225] : memref<8x4x2x32xf32, #tpu.memory_space<vmem>>, vector<1x4x2x32xf32>
    %398 = vector.shape_cast %397 : vector<1x4x2x32xf32> to vector<4x2x32xf32>
    %399 = vector.extract_strided_slice %398 {offsets = [0, 0, 0], sizes = [1, 2, 32], strides = [1, 1, 1]} : vector<4x2x32xf32> to vector<1x2x32xf32>
    %400 = vector.shape_cast %399 : vector<1x2x32xf32> to vector<2x32xf32>
    %c0_226 = arith.constant 0 : index
    %c0_227 = arith.constant 0 : index
    %c0_228 = arith.constant 0 : index
    %401 = vector.load %arg2[%c0_226, %c0_227, %c0_228] : memref<4x32x32xf32, #tpu.memory_space<vmem>>, vector<1x32x32xf32>
    %402 = vector.shape_cast %401 : vector<1x32x32xf32> to vector<32x32xf32>
    %cst_229 = arith.constant dense<0.000000e+00> : vector<2x32xf32>
    %403 = tpu.matmul %395, %402, %cst_229 {dimension_numbers = #tpu.dot_dimension_numbers<[1], [0], [0], [1], [0, 0, 1, 1], [], []>} : vector<2x32xf32>, vector<32x32xf32>, vector<2x32xf32> -> vector<2x32xf32>
    %404 = arith.addf %400, %403 : vector<2x32xf32>
    %405 = arith.negf %404 : vector<2x32xf32>
    %406 = math.exp %405 : vector<2x32xf32>
    %cst_230 = arith.constant 1.000000e+00 : f32
    %407 = vector.broadcast %cst_230 : f32 to vector<2x32xf32>
    %408 = arith.addf %407, %406 : vector<2x32xf32>
    %409 = arith.divf %407, %408 : vector<2x32xf32>
    %410 = vector.extract_strided_slice %398 {offsets = [1, 0, 0], sizes = [1, 2, 32], strides = [1, 1, 1]} : vector<4x2x32xf32> to vector<1x2x32xf32>
    %411 = vector.shape_cast %410 : vector<1x2x32xf32> to vector<2x32xf32>
    %c1_231 = arith.constant 1 : index
    %c0_232 = arith.constant 0 : index
    %c0_233 = arith.constant 0 : index
    %412 = vector.load %arg2[%c1_231, %c0_232, %c0_233] : memref<4x32x32xf32, #tpu.memory_space<vmem>>, vector<1x32x32xf32>
    %413 = vector.shape_cast %412 : vector<1x32x32xf32> to vector<32x32xf32>
    %cst_234 = arith.constant dense<0.000000e+00> : vector<2x32xf32>
    %414 = tpu.matmul %395, %413, %cst_234 {dimension_numbers = #tpu.dot_dimension_numbers<[1], [0], [0], [1], [0, 0, 1, 1], [], []>} : vector<2x32xf32>, vector<32x32xf32>, vector<2x32xf32> -> vector<2x32xf32>
    %415 = arith.addf %411, %414 : vector<2x32xf32>
    %416 = arith.negf %415 : vector<2x32xf32>
    %417 = math.exp %416 : vector<2x32xf32>
    %cst_235 = arith.constant 1.000000e+00 : f32
    %418 = vector.broadcast %cst_235 : f32 to vector<2x32xf32>
    %419 = arith.addf %418, %417 : vector<2x32xf32>
    %420 = arith.divf %418, %419 : vector<2x32xf32>
    %421 = vector.extract_strided_slice %398 {offsets = [2, 0, 0], sizes = [1, 2, 32], strides = [1, 1, 1]} : vector<4x2x32xf32> to vector<1x2x32xf32>
    %422 = vector.shape_cast %421 : vector<1x2x32xf32> to vector<2x32xf32>
    %c2_236 = arith.constant 2 : index
    %c0_237 = arith.constant 0 : index
    %c0_238 = arith.constant 0 : index
    %423 = vector.load %arg2[%c2_236, %c0_237, %c0_238] : memref<4x32x32xf32, #tpu.memory_space<vmem>>, vector<1x32x32xf32>
    %424 = vector.shape_cast %423 : vector<1x32x32xf32> to vector<32x32xf32>
    %cst_239 = arith.constant dense<0.000000e+00> : vector<2x32xf32>
    %425 = tpu.matmul %395, %424, %cst_239 {dimension_numbers = #tpu.dot_dimension_numbers<[1], [0], [0], [1], [0, 0, 1, 1], [], []>} : vector<2x32xf32>, vector<32x32xf32>, vector<2x32xf32> -> vector<2x32xf32>
    %426 = arith.addf %422, %425 : vector<2x32xf32>
    %427 = math.tanh %426 : vector<2x32xf32>
    %428 = vector.extract_strided_slice %398 {offsets = [3, 0, 0], sizes = [1, 2, 32], strides = [1, 1, 1]} : vector<4x2x32xf32> to vector<1x2x32xf32>
    %429 = vector.shape_cast %428 : vector<1x2x32xf32> to vector<2x32xf32>
    %c3_240 = arith.constant 3 : index
    %c0_241 = arith.constant 0 : index
    %c0_242 = arith.constant 0 : index
    %430 = vector.load %arg2[%c3_240, %c0_241, %c0_242] : memref<4x32x32xf32, #tpu.memory_space<vmem>>, vector<1x32x32xf32>
    %431 = vector.shape_cast %430 : vector<1x32x32xf32> to vector<32x32xf32>
    %cst_243 = arith.constant dense<0.000000e+00> : vector<2x32xf32>
    %432 = tpu.matmul %395, %431, %cst_243 {dimension_numbers = #tpu.dot_dimension_numbers<[1], [0], [0], [1], [0, 0, 1, 1], [], []>} : vector<2x32xf32>, vector<32x32xf32>, vector<2x32xf32> -> vector<2x32xf32>
    %433 = arith.addf %429, %432 : vector<2x32xf32>
    %434 = arith.negf %433 : vector<2x32xf32>
    %435 = math.exp %434 : vector<2x32xf32>
    %cst_244 = arith.constant 1.000000e+00 : f32
    %436 = vector.broadcast %cst_244 : f32 to vector<2x32xf32>
    %437 = arith.addf %436, %435 : vector<2x32xf32>
    %438 = arith.divf %436, %437 : vector<2x32xf32>
    %c0_245 = arith.constant 0 : index
    %c0_246 = arith.constant 0 : index
    %439 = vector.load %arg5[%c0_245, %c0_246] : memref<2x32xf32, #tpu.memory_space<vmem>>, vector<2x32xf32>
    %440 = arith.mulf %420, %439 : vector<2x32xf32>
    %441 = arith.mulf %409, %427 : vector<2x32xf32>
    %442 = arith.addf %440, %441 : vector<2x32xf32>
    %443 = math.tanh %442 : vector<2x32xf32>
    %444 = arith.mulf %438, %443 : vector<2x32xf32>
    %c0_247 = arith.constant 0 : index
    %c0_248 = arith.constant 0 : index
    %445 = vector.load %arg5[%c0_247, %c0_248] : memref<2x32xf32, #tpu.memory_space<vmem>>, vector<2x32xf32>
    tpu.vector_store %arg5[%c0_247, %c0_248], %442 {strides = array<i32>} : memref<2x32xf32, #tpu.memory_space<vmem>>, vector<2x32xf32>,
    %c0_249 = arith.constant 0 : index
    %c0_250 = arith.constant 0 : index
    %446 = vector.load %arg4[%c0_249, %c0_250] : memref<2x32xf32, #tpu.memory_space<vmem>>, vector<2x32xf32>
    tpu.vector_store %arg4[%c0_249, %c0_250], %444 {strides = array<i32>} : memref<2x32xf32, #tpu.memory_space<vmem>>, vector<2x32xf32>,
    %447 = arith.index_cast %c7_i32 : i32 to index
    %c0_251 = arith.constant 0 : index
    %c0_252 = arith.constant 0 : index
    %448 = vector.load %arg3[%447, %c0_251, %c0_252] : memref<8x2x32xf32, #tpu.memory_space<vmem>>, vector<1x2x32xf32>
    %449 = vector.shape_cast %448 : vector<1x2x32xf32> to vector<2x32xf32>
    %450 = vector.shape_cast %444 : vector<2x32xf32> to vector<1x2x32xf32>
    tpu.vector_store %arg3[%447, %c0_251, %c0_252], %450 {strides = array<i32>} : memref<8x2x32xf32, #tpu.memory_space<vmem>>, vector<1x2x32xf32>,
    %c8_i32 = arith.constant 8 : i32
    return
  }
  func.func @transform_0(%arg0: i32) -> (i32, i32, i32, i32) {
    %c0_i32 = arith.constant 0 : i32
    %c0_i32_0 = arith.constant 0 : i32
    %c0_i32_1 = arith.constant 0 : i32
    %c0_i32_2 = arith.constant 0 : i32
    return %arg0, %c0_i32, %c0_i32_0, %c0_i32_1 : i32, i32, i32, i32
  }
  func.func @transform_1(%arg0: i32) -> (i32, i32, i32) {
    %c0_i32 = arith.constant 0 : i32
    %c0_i32_0 = arith.constant 0 : i32
    %c0_i32_1 = arith.constant 0 : i32
    %c0_i32_2 = arith.constant 0 : i32
    return %c0_i32, %c0_i32_0, %c0_i32_1 : i32, i32, i32
  }
  func.func @transform_2(%arg0: i32) -> (i32, i32, i32) {
    %c0_i32 = arith.constant 0 : i32
    %c0_i32_0 = arith.constant 0 : i32
    %c0_i32_1 = arith.constant 0 : i32
    return %arg0, %c0_i32, %c0_i32_0 : i32, i32, i32
  }
}

</mosaic_0001>

<bundles_post_ra>
// kernel: tpu_custom_call.1
= control target key start
LH: loop header
LB: loop body
LE: loop exit
PB: predicated region body
PF: predicated region fallthrough
CT: control target
= control target key end

     0   :  { %7 = vsyncpa [#allocation5], 0  ;;  %s4026_s0 = inlined_call_operand.hbm [shape: f32[8,4,2,32], index: 0, kind: input, shape index: {}]   ;;  %s4027_s1 = inlined_call_operand.hbm [shape: f32[4,32,32], index: 1, kind: input, shape index: {}]   ;;  %s4028_s2 = inlined_call_operand.hbm [shape: f32[8,2,32], index: 2, kind: output, shape index: {}]  }
   0x1   :  { %8 = vsyncpa [#allocation8], 0 }
   0x2   :  { %9 = vsyncpa [#allocation6], 0  ;;  %s3543_s9 = smov [#allocation4]  }
   0x3   :  { %s15_s10 = sshll.u32 %s3543_s9, 4  ;;  %s16_s10 = int_to_ptr.vmem [resolvable:$true] %s15_s10 }
   0x4   :  { %s3485_s11 = scalar_lea.vmem %s16_s10, 1024  ;;  %p3490_p1 = scmp.lt.s32.totalorder %s16_s10, %s16_s10 }
   0x5   :  { %p3486_p0 = scmp.ne.s32.totalorder %s16_s10, %s3485_s11  ;;  %p3491_p2 = scmp.lt.s32.totalorder %s3485_s11, %s3485_s11 }
   0x7   :  { %p3492_p3 = por %p3491_p2, %p3490_p1 }
   0x9   :  { %p3493_p4 = pnand %p3492_p3, %p3486_p0 }
   0xb   :  { %3496 = shalt.err (!%p3493_p4)
}
   0xc   :  { %s3544_s12 = smov 32   ;;  %s3545_s13 = smov 2  }
   0xd   :  { %21 = dma.hbm_to_vmem [thread:$0]  %s4026_s0, 1024, %s16_s10, [#allocation5], %s3544_s12, %s3544_s12, %s3545_s13  }
   0xe   :  { %s3546_s16 = smov [#allocation7]  }
   0xf   :  { %s27_s17 = sshll.u32 %s3546_s16, 4  ;;  %s28_s17 = int_to_ptr.vmem [resolvable:$true] %s27_s17 }
  0x10   :  { %s3505_s18 = scalar_lea.vmem %s28_s17, 2048  ;;  %p3510_p6 = scmp.lt.s32.totalorder %s28_s17, %s28_s17 }
  0x11   :  { %p3506_p5 = scmp.ne.s32.totalorder %s28_s17, %s3505_s18  ;;  %p3511_p7 = scmp.lt.s32.totalorder %s3505_s18, %s3505_s18 }
  0x13   :  { %p3512_p8 = por %p3511_p7, %p3510_p6 }
  0x15   :  { %p3513_p9 = pnand %p3512_p8, %p3506_p5 }
  0x17   :  { %3516 = shalt.err (!%p3513_p9)
}
  0x18   :  { %s3547_s19 = smov 128   ;;  %s3548_s20 = smov 8  }
  0x19   :  { %33 = dma.hbm_to_vmem [thread:$0]  %s4027_s1, 2048, %s28_s17, [#allocation8], %s3547_s19, %s3547_s19, %s3548_s20  }
  0x1a   :  { %3537 = dma.done.wait [#allocation5], 1024  }
  0x1b   :  { %3538 = vsyncadd [#allocation5], 4294966272 }
  0x1c   :  { %3539 = dma.done.wait [#allocation8], 2048  }
  0x1d   :  { %3540 = vsyncadd [#allocation8], 4294965248  ;;  %vm44_vm0 = vcmask 254976   ;;  %v3549_v0 = vmov 0.0   ;;  %vm3550_vm1 = vmmov 0   ;;  %v3586_v1 = vld [vmem:[#allocation7 + $0x18] sm:$0xff] }
  0x1e   :  { %2988 = vmatprep.subr.mxu0 %v3549_v0  ;;  %2999 = vmatprep.subr.mxu1 %v3549_v0  ;;  %45 = vst.msk [vmem:[#allocation2] sm:$0x3] %vm44_vm0, %v3549_v0  ;;  %46 = vst.msk [vmem:[#allocation3] sm:$0x3] %vm44_vm0, %v3549_v0  ;;  %v3588_v2 = vld [vmem:[#allocation7 + $0x38] sm:$0xff]  ;;  %v3590_v3 = vld [vmem:[#allocation7 + $0x10] sm:$0xff] }
  0x1f   :  { %2996 = vmatprep.mubr.msk.f32.mxu0 %vm3550_vm1, %v3549_v0  ;;  %3007 = vmatprep.mubr.msk.f32.mxu1 %vm3550_vm1, %v3549_v0  ;;  %v3594_v4 = vld [vmem:[#allocation7 + $0x30] sm:$0xff]  ;;  %v3598_v5 = vld [vmem:[#allocation7 + $0x8] sm:$0xff]  ;;  %v3606_v7 = vld [vmem:[#allocation7] sm:$0xff]  ;;  %vm56_vm2 = vcmask 261120   ;;  %s3551_s0 = smov [#allocation9]  }
  0x20   :  { %2989 = vmatpush3.msra.mxu0 %v3586_v1  ;;  %3000 = vmatpush3.msra.mxu1 %v3588_v2  ;;  %v3600_v6 = vld [vmem:[#allocation7 + $0x28] sm:$0xff]  ;;  %v3608_v8 = vld [vmem:[#allocation7 + $0x20] sm:$0xff]  ;;  %v3616_v10 = vld [vmem:[#allocation7 + $0x58] sm:$0xff]  ;;  %s2759_s1 = sshll.u32 %s3551_s0, 4  ;;  %s2760_s1 = int_to_ptr.vmem [resolvable:$true] %s2759_s1 }
  0x21   :  { %2990 = vmatprep.subr.mxu0 %v3549_v0  ;;  %3001 = vmatprep.subr.mxu1 %v3549_v0  ;;  %v3618_v11 = vld [vmem:[#allocation7 + $0x78] sm:$0xff]  ;;  %v3624_v12 = vld [vmem:[#allocation7 + $0x50] sm:$0xff]  ;;  %v3632_v14 = vld [vmem:[#allocation7 + $0x48] sm:$0xff]  ;;  %s3517_s23 = scalar_lea.vmem %s2760_s1, 256  ;;  %p3522_p11 = scmp.lt.s32.totalorder %s2760_s1, %s2760_s1 }
  0x22   :  { %2991 = vmatpush3.msra.mxu0 %v3590_v3  ;;  %3002 = vmatpush3.msra.mxu1 %v3594_v4  ;;  %v3626_v13 = vld [vmem:[#allocation7 + $0x70] sm:$0xff]  ;;  %v3634_v15 = vld [vmem:[#allocation7 + $0x68] sm:$0xff]  ;;  %v3640_v16 = vld [vmem:[#allocation7 + $0x40] sm:$0xff]  ;;  %p3518_p10 = scmp.ne.s32.totalorder %s2760_s1, %s3517_s23  ;;  %p3523_p12 = scmp.lt.s32.totalorder %s3517_s23, %s3517_s23 }
  0x23   :  { %2992 = vmatprep.subr.mxu0 %v3549_v0  ;;  %3003 = vmatprep.subr.mxu1 %v3549_v0  ;;  %v3644_v17 = vld [vmem:[#allocation7 + $0x60] sm:$0xff]  ;;  %v390_v54 = vld [vmem:[#allocation4 + $0x8] sm:$0x3]  ;;  %v391_v55 = vld [vmem:[#allocation4 + $0xa] sm:$0x3] }
  0x24   :  { %2993 = vmatpush3.msra.mxu0 %v3598_v5  ;;  %3004 = vmatpush3.msra.mxu1 %v3600_v6  ;;  %v48_v18 = vld [vmem:[#allocation4] sm:$0x3]  ;;  %v49_v19 = vld [vmem:[#allocation4 + $0x2] sm:$0x3]  ;;  %v51_v28 = vld [vmem:[#allocation4 + $0x6] sm:$0x3]  ;;  %p3524_p13 = por %p3523_p12, %p3522_p11 }
  0x25   :  { %v47_v9 = vld [vmem:[#allocation2] sm:$0x3]  ;;  %2994 = vmatprep.subr.mxu0 %v3549_v0  ;;  %3005 = vmatprep.subr.mxu1 %v3549_v0  ;;  %v50_v32 = vld [vmem:[#allocation4 + $0x4] sm:$0x3]  ;;  %v378_v43 = vld [vmem:[#allocation3] sm:$0x3] }
  0x26   :  { %2995 = vmatpush3.msra.mxu0 %v3606_v7  ;;  %3006 = vmatpush3.msra.mxu1 %v3608_v8  ;;  %p3525_p0 = pnand %p3524_p13, %p3518_p10 }
  0x27   :  { %2997 = vmatmul.mubr.msk.f32.vlgmr.msra.gmra.mxu0 %vm56_vm2, %v47_v9  ;;  %3008 = vmatmul.mubr.msk.f32.vlgmr.msra.gmra.mxu1 %vm56_vm2, %v47_v9 }
  0x28   :  { %3010 = vmatprep.subr.mxu0 %v3549_v0  ;;  %3021 = vmatprep.subr.mxu1 %v3549_v0 }
  0x29   :  { %3011 = vmatpush3.msra.mxu0 %v3616_v10  ;;  %3022 = vmatpush3.msra.mxu1 %v3618_v11 }
  0x2a   :  { %3012 = vmatprep.subr.mxu0 %v3549_v0  ;;  %3023 = vmatprep.subr.mxu1 %v3549_v0 }
  0x2b   :  { %3013 = vmatpush3.msra.mxu0 %v3624_v12  ;;  %3024 = vmatpush3.msra.mxu1 %v3626_v13 }
  0x2c   :  { %3014 = vmatprep.subr.mxu0 %v3549_v0  ;;  %3025 = vmatprep.subr.mxu1 %v3549_v0 }
  0x2d   :  { %3015 = vmatpush3.msra.mxu0 %v3632_v14  ;;  %3026 = vmatpush3.msra.mxu1 %v3634_v15 }
  0x2e   :  { %3016 = vmatprep.subr.mxu0 %v3549_v0  ;;  %3027 = vmatprep.subr.mxu1 %v3549_v0 }
  0x2f   :  { %3017 = vmatpush3.msra.mxu0 %v3640_v16  ;;  %3018 = vmatprep.mubr.msk.f32.mxu0 %vm3550_vm1, %v3549_v0 }
  0x30   :  { %3028 = vmatpush3.msra.mxu1 %v3644_v17  ;;  %3029 = vmatprep.mubr.msk.f32.mxu1 %vm3550_vm1, %v3549_v0 }
  0x31   :  { %3019 = vmatmul.mubr.msk.f32.vlgmr.msra.gmra.mxu0 %vm56_vm2, %v47_v9  ;;  %3030 = vmatmul.mubr.msk.f32.vlgmr.msra.gmra.mxu1 %vm56_vm2, %v47_v9  ;;  %v393_v9 = vld [vmem:[#allocation4 + $0xe] sm:$0x3] }
  0x32   :  { %3032 = vmatprep.subr.mxu0 %v3549_v0  ;;  %3043 = vmatprep.subr.mxu1 %v3549_v0 }
  0x33   :  { %3033 = vmatpush3.msra.mxu0 %v3586_v1  ;;  %3044 = vmatpush3.msra.mxu1 %v3588_v2 }
  0x34   :  { %3034 = vmatprep.subr.mxu0 %v3549_v0  ;;  %3045 = vmatprep.subr.mxu1 %v3549_v0 }
  0x35   :  { %3035 = vmatpush3.msra.mxu0 %v3590_v3  ;;  %3046 = vmatpush3.msra.mxu1 %v3594_v4 }
  0x36   :  { %3036 = vmatprep.subr.mxu0 %v3549_v0  ;;  %3047 = vmatprep.subr.mxu1 %v3549_v0 }
  0x37   :  { %3037 = vmatpush3.msra.mxu0 %v3598_v5  ;;  %3048 = vmatpush3.msra.mxu1 %v3600_v6 }
  0x38   :  { %3038 = vmatprep.subr.mxu0 %v3549_v0  ;;  %3049 = vmatprep.subr.mxu1 %v3549_v0 }
  0x39   :  { %3039 = vmatpush3.msra.mxu0 %v3606_v7  ;;  %3050 = vmatpush3.msra.mxu1 %v3608_v8 }
  0x3a   :  { %3040 = vmatprep.mubr.msk.f32.mxu0 %vm3550_vm1, %v3549_v0  ;;  %3051 = vmatprep.mubr.msk.f32.mxu1 %vm3550_vm1, %v3549_v0 }
  0x3b   :  { %3054 = vmatprep.subr.mxu0 %v3549_v0  ;;  %3065 = vmatprep.subr.mxu1 %v3549_v0 }
  0xe7   :  { %v126_v20 = vpop.f32.mrf.mxu0  ;;  %v208_v21 = vpop.f32.mrf.mxu1 }
  0xe8   :  { %v130_v22 = vadd.f32 %v126_v20, %v48_v18  ;;  %v212_v23 = vadd.f32 %v208_v21, %v49_v19 }
  0xe9   :  { %v2998_v24 = vpop.f32.mrf.mxu0  ;;  %v3009_v25 = vpop.f32.mrf.mxu1 }
  0xea   :  { %v2773_v26 = vmul.f32 -1.442695, %v130_v22  ;;  %v2775_v27 = vmul.f32 -1.442695, %v212_v23  ;;  %v392_v23 = vld [vmem:[#allocation4 + $0xc] sm:$0x3] }
  0xec   :  { %3349 = vpow2.f32 %v2773_v26 }
  0xed   :  { %3351 = vpow2.f32 %v2775_v27 }
  0xf1   :  { %v290_v29 = vpop.f32.mrf.mxu0  ;;  %v367_v30 = vpop.f32.mrf.mxu1 }
  0xf2   :  { %v371_v31 = vadd.f32 %v367_v30, %v51_v28  ;;  %v294_v36 = vadd.f32 %v290_v29, %v50_v32 }
  0xf3   :  { %v3020_v33 = vpop.f32.mrf.mxu0  ;;  %v3031_v34 = vpop.f32.mrf.mxu1 }
  0xf4   :  { %v2778_v35 = vmul.f32 -1.442695, %v371_v31 }
  0xf6   :  { %3353 = vpow2.f32 %v2778_v35 }
  0xf7   :  { %3355 = vtanh.f32 %v294_v36 }
  0xf9   :  { %v3350_v37 = vpop.eup %3349 }
  0xfa   :  { %v3352_v38 = vpop.eup %3351  ;;  %v134_v39 = vadd.f32 1.0, %v3350_v37 }
  0xfb   :  { %v216_v40 = vadd.f32 1.0, %v3352_v38 }
  0xfc   :  { %3357 = vrcp.f32 %v134_v39 }
  0xfd   :  { %3359 = vrcp.f32 %v216_v40 }
 0x103   :  { %v3354_v41 = vpop.eup %3353 }
 0x104   :  { %v3356_v42 = vpop.eup %3355  ;;  %v375_v45 = vadd.f32 1.0, %v3354_v41 }
 0x106   :  { %3361 = vrcp.f32 %v375_v45 }
 0x109   :  { %v3358_v44 = vpop.eup %3357 }
 0x10a   :  { %v3360_v46 = vpop.eup %3359  ;;  %v380_v47 = vmul.f32 %v3358_v44, %v3356_v42  ;;  %v729_v44 = vld [vmem:[#allocation4 + $0x12] sm:$0x3] }
 0x10b   :  { %v379_v48 = vmul.f32 %v3360_v46, %v378_v43  ;;  %v728_v43 = vld [vmem:[#allocation4 + $0x10] sm:$0x3] }
 0x10d   :  { %v381_v49 = vadd.f32 %v380_v47, %v379_v48 }
 0x10f   :  { %3363 = vtanh.f32 %v381_v49  ;;  %385 = vst.msk [vmem:[#allocation3] sm:$0x3] %vm44_vm0, %v381_v49 }
 0x113   :  { %v3362_v50 = vpop.eup %3361 }
 0x116   :  { %v716_v34 = vld [vmem:[#allocation3] sm:$0x3] }
 0x11c   :  { %v3364_v51 = vpop.eup %3363 }
 0x11d   :  { %v383_v52 = vmul.f32 %v3364_v51, %v3362_v50 }
 0x11f   :  { %386 = vst.msk [vmem:[#allocation2] sm:$0x3] %vm44_vm0, %v383_v52  ;;  %387 = vst.msk [vmem:[#allocation9] sm:$0x3] %vm44_vm0, %v383_v52 }
 0x126   :  { %v388_v53 = vld [vmem:[#allocation2] sm:$0x3] }
 0x127   :  { %3041 = vmatmul.mubr.msk.f32.vlgmr.msra.gmra.mxu0 %vm56_vm2, %v388_v53  ;;  %3052 = vmatmul.mubr.msk.f32.vlgmr.msra.gmra.mxu1 %vm56_vm2, %v388_v53 }
 0x128   :  { %3055 = vmatpush3.msra.mxu0 %v3616_v10  ;;  %3066 = vmatpush3.msra.mxu1 %v3618_v11 }
 0x129   :  { %3056 = vmatprep.subr.mxu0 %v3549_v0  ;;  %3067 = vmatprep.subr.mxu1 %v3549_v0 }
 0x12a   :  { %3057 = vmatpush3.msra.mxu0 %v3624_v12  ;;  %3068 = vmatpush3.msra.mxu1 %v3626_v13 }
 0x12b   :  { %3058 = vmatprep.subr.mxu0 %v3549_v0  ;;  %3069 = vmatprep.subr.mxu1 %v3549_v0 }
 0x12c   :  { %3059 = vmatpush3.msra.mxu0 %v3632_v14  ;;  %3070 = vmatpush3.msra.mxu1 %v3634_v15 }
 0x12d   :  { %3060 = vmatprep.subr.mxu0 %v3549_v0  ;;  %3071 = vmatprep.subr.mxu1 %v3549_v0 }
 0x12e   :  { %3061 = vmatpush3.msra.mxu0 %v3640_v16  ;;  %3062 = vmatprep.mubr.msk.f32.mxu0 %vm3550_vm1, %v3549_v0 }
 0x12f   :  { %3072 = vmatpush3.msra.mxu1 %v3644_v17  ;;  %3073 = vmatprep.mubr.msk.f32.mxu1 %vm3550_vm1, %v3549_v0 }
 0x130   :  { %3063 = vmatmul.mubr.msk.f32.vlgmr.msra.gmra.mxu0 %vm56_vm2, %v388_v53  ;;  %3074 = vmatmul.mubr.msk.f32.vlgmr.msra.gmra.mxu1 %vm56_vm2, %v388_v53  ;;  %v731_v53 = vld [vmem:[#allocation4 + $0x16] sm:$0x3] }
 0x131   :  { %3076 = vmatprep.subr.mxu0 %v3549_v0  ;;  %3087 = vmatprep.subr.mxu1 %v3549_v0 }
 0x132   :  { %3077 = vmatpush3.msra.mxu0 %v3586_v1  ;;  %3088 = vmatpush3.msra.mxu1 %v3588_v2 }
 0x133   :  { %3078 = vmatprep.subr.mxu0 %v3549_v0  ;;  %3089 = vmatprep.subr.mxu1 %v3549_v0 }
 0x134   :  { %3079 = vmatpush3.msra.mxu0 %v3590_v3  ;;  %3090 = vmatpush3.msra.mxu1 %v3594_v4 }
 0x135   :  { %3080 = vmatprep.subr.mxu0 %v3549_v0  ;;  %3091 = vmatprep.subr.mxu1 %v3549_v0 }
 0x136   :  { %3081 = vmatpush3.msra.mxu0 %v3598_v5  ;;  %3092 = vmatpush3.msra.mxu1 %v3600_v6 }
 0x137   :  { %3082 = vmatprep.subr.mxu0 %v3549_v0  ;;  %3093 = vmatprep.subr.mxu1 %v3549_v0 }
 0x138   :  { %3083 = vmatpush3.msra.mxu0 %v3606_v7  ;;  %3094 = vmatpush3.msra.mxu1 %v3608_v8 }
 0x139   :  { %3084 = vmatprep.mubr.msk.f32.mxu0 %vm3550_vm1, %v3549_v0  ;;  %3095 = vmatprep.mubr.msk.f32.mxu1 %vm3550_vm1, %v3549_v0 }
 0x13a   :  { %3098 = vmatprep.subr.mxu0 %v3549_v0  ;;  %3109 = vmatprep.subr.mxu1 %v3549_v0 }
 0x1e7   :  { %v467_v56 = vpop.f32.mrf.mxu0  ;;  %v548_v57 = vpop.f32.mrf.mxu1 }
 0x1e8   :  { %v471_v58 = vadd.f32 %v467_v56, %v390_v54  ;;  %v552_v59 = vadd.f32 %v548_v57, %v391_v55 }
 0x1e9   :  { %v3042_v60 = vpop.f32.mrf.mxu0  ;;  %v3053_v61 = vpop.f32.mrf.mxu1 }
 0x1ea   :  { %v2780_v62 = vmul.f32 -1.442695, %v471_v58  ;;  %v2782_v63 = vmul.f32 -1.442695, %v552_v59  ;;  %v730_v59 = vld [vmem:[#allocation4 + $0x14] sm:$0x3] }
 0x1ec   :  { %3365 = vpow2.f32 %v2780_v62 }
 0x1ed   :  { %3367 = vpow2.f32 %v2782_v63 }
 0x1f0   :  { %v629_v18 = vpop.f32.mrf.mxu0  ;;  %v705_v19 = vpop.f32.mrf.mxu1 }
 0x1f1   :  { %v709_v20 = vadd.f32 %v705_v19, %v393_v9  ;;  %v633_v25 = vadd.f32 %v629_v18, %v392_v23 }
 0x1f2   :  { %v3064_v21 = vpop.f32.mrf.mxu0  ;;  %v3075_v22 = vpop.f32.mrf.mxu1 }
 0x1f3   :  { %v2785_v24 = vmul.f32 -1.442695, %v709_v20 }
 0x1f5   :  { %3369 = vpow2.f32 %v2785_v24 }
 0x1f6   :  { %3371 = vtanh.f32 %v633_v25 }
 0x1f9   :  { %v3366_v26 = vpop.eup %3365 }
 0x1fa   :  { %v3368_v27 = vpop.eup %3367  ;;  %v475_v28 = vadd.f32 1.0, %v3366_v26 }
 0x1fb   :  { %v556_v29 = vadd.f32 1.0, %v3368_v27 }
 0x1fc   :  { %3373 = vrcp.f32 %v475_v28 }
 0x1fd   :  { %3375 = vrcp.f32 %v556_v29 }
 0x202   :  { %v3370_v30 = vpop.eup %3369 }
 0x203   :  { %v3372_v31 = vpop.eup %3371  ;;  %v713_v36 = vadd.f32 1.0, %v3370_v30 }
 0x205   :  { %3377 = vrcp.f32 %v713_v36 }
 0x209   :  { %v3374_v32 = vpop.eup %3373 }
 0x20a   :  { %v3376_v33 = vpop.eup %3375  ;;  %v718_v35 = vmul.f32 %v3374_v32, %v3372_v31  ;;  %v1066_v32 = vld [vmem:[#allocation4 + $0x18] sm:$0x3] }
 0x20b   :  { %v717_v37 = vmul.f32 %v3376_v33, %v716_v34  ;;  %v1067_v33 = vld [vmem:[#allocation4 + $0x1a] sm:$0x3] }
 0x20d   :  { %v719_v38 = vadd.f32 %v718_v35, %v717_v37 }
 0x20f   :  { %3379 = vtanh.f32 %v719_v38  ;;  %722 = vst.msk [vmem:[#allocation3] sm:$0x3] %vm44_vm0, %v719_v38 }
 0x212   :  { %v3378_v39 = vpop.eup %3377 }
 0x216   :  { %v1054_v23 = vld [vmem:[#allocation3] sm:$0x3] }
 0x21c   :  { %v3380_v40 = vpop.eup %3379 }
 0x21d   :  { %v721_v41 = vmul.f32 %v3380_v40, %v3378_v39 }
 0x21f   :  { %723 = vst.msk [vmem:[#allocation2] sm:$0x3] %vm44_vm0, %v721_v41  ;;  %725 = vst.msk [vmem:[#allocation9 + $0x2] sm:$0x3] %vm44_vm0, %v721_v41 }
 0x226   :  { %v726_v42 = vld [vmem:[#allocation2] sm:$0x3] }
 0x227   :  { %3085 = vmatmul.mubr.msk.f32.vlgmr.msra.gmra.mxu0 %vm56_vm2, %v726_v42  ;;  %3096 = vmatmul.mubr.msk.f32.vlgmr.msra.gmra.mxu1 %vm56_vm2, %v726_v42 }
 0x228   :  { %3099 = vmatpush3.msra.mxu0 %v3616_v10  ;;  %3110 = vmatpush3.msra.mxu1 %v3618_v11 }
 0x229   :  { %3100 = vmatprep.subr.mxu0 %v3549_v0  ;;  %3111 = vmatprep.subr.mxu1 %v3549_v0 }
 0x22a   :  { %3101 = vmatpush3.msra.mxu0 %v3624_v12  ;;  %3112 = vmatpush3.msra.mxu1 %v3626_v13 }
 0x22b   :  { %3102 = vmatprep.subr.mxu0 %v3549_v0  ;;  %3113 = vmatprep.subr.mxu1 %v3549_v0 }
 0x22c   :  { %3103 = vmatpush3.msra.mxu0 %v3632_v14  ;;  %3114 = vmatpush3.msra.mxu1 %v3634_v15 }
 0x22d   :  { %3104 = vmatprep.subr.mxu0 %v3549_v0  ;;  %3115 = vmatprep.subr.mxu1 %v3549_v0 }
 0x22e   :  { %3105 = vmatpush3.msra.mxu0 %v3640_v16  ;;  %3106 = vmatprep.mubr.msk.f32.mxu0 %vm3550_vm1, %v3549_v0 }
 0x22f   :  { %3116 = vmatpush3.msra.mxu1 %v3644_v17  ;;  %3117 = vmatprep.mubr.msk.f32.mxu1 %vm3550_vm1, %v3549_v0 }
 0x230   :  { %3107 = vmatmul.mubr.msk.f32.vlgmr.msra.gmra.mxu0 %vm56_vm2, %v726_v42  ;;  %3118 = vmatmul.mubr.msk.f32.vlgmr.msra.gmra.mxu1 %vm56_vm2, %v726_v42  ;;  %v1069_v42 = vld [vmem:[#allocation4 + $0x1e] sm:$0x3] }
 0x231   :  { %3120 = vmatprep.subr.mxu0 %v3549_v0  ;;  %3131 = vmatprep.subr.mxu1 %v3549_v0 }
 0x232   :  { %3121 = vmatpush3.msra.mxu0 %v3586_v1  ;;  %3132 = vmatpush3.msra.mxu1 %v3588_v2 }
 0x233   :  { %3122 = vmatprep.subr.mxu0 %v3549_v0  ;;  %3133 = vmatprep.subr.mxu1 %v3549_v0 }
 0x234   :  { %3123 = vmatpush3.msra.mxu0 %v3590_v3  ;;  %3134 = vmatpush3.msra.mxu1 %v3594_v4 }
 0x235   :  { %3124 = vmatprep.subr.mxu0 %v3549_v0  ;;  %3135 = vmatprep.subr.mxu1 %v3549_v0 }
 0x236   :  { %3125 = vmatpush3.msra.mxu0 %v3598_v5  ;;  %3136 = vmatpush3.msra.mxu1 %v3600_v6 }
 0x237   :  { %3126 = vmatprep.subr.mxu0 %v3549_v0  ;;  %3137 = vmatprep.subr.mxu1 %v3549_v0 }
 0x238   :  { %3127 = vmatpush3.msra.mxu0 %v3606_v7  ;;  %3138 = vmatpush3.msra.mxu1 %v3608_v8 }
 0x239   :  { %3128 = vmatprep.mubr.msk.f32.mxu0 %vm3550_vm1, %v3549_v0  ;;  %3139 = vmatprep.mubr.msk.f32.mxu1 %vm3550_vm1, %v3549_v0 }
 0x23a   :  { %3142 = vmatprep.subr.mxu0 %v3549_v0  ;;  %3153 = vmatprep.subr.mxu1 %v3549_v0 }
 0x2e7   :  { %v805_v45 = vpop.f32.mrf.mxu0  ;;  %v886_v46 = vpop.f32.mrf.mxu1 }
 0x2e8   :  { %v809_v47 = vadd.f32 %v805_v45, %v728_v43  ;;  %v890_v48 = vadd.f32 %v886_v46, %v729_v44 }
 0x2e9   :  { %v3086_v49 = vpop.f32.mrf.mxu0  ;;  %v3097_v50 = vpop.f32.mrf.mxu1 }
 0x2ea   :  { %v2787_v51 = vmul.f32 -1.442695, %v809_v47  ;;  %v2789_v52 = vmul.f32 -1.442695, %v890_v48  ;;  %v1068_v48 = vld [vmem:[#allocation4 + $0x1c] sm:$0x3] }
 0x2ec   :  { %3381 = vpow2.f32 %v2787_v51 }
 0x2ed   :  { %3383 = vpow2.f32 %v2789_v52 }
 0x2f0   :  { %v967_v54 = vpop.f32.mrf.mxu0  ;;  %v1043_v55 = vpop.f32.mrf.mxu1 }
 0x2f1   :  { %v1047_v56 = vadd.f32 %v1043_v55, %v731_v53  ;;  %v971_v61 = vadd.f32 %v967_v54, %v730_v59 }
 0x2f2   :  { %v3108_v57 = vpop.f32.mrf.mxu0  ;;  %v3119_v58 = vpop.f32.mrf.mxu1 }
 0x2f3   :  { %v2792_v60 = vmul.f32 -1.442695, %v1047_v56 }
 0x2f5   :  { %3385 = vpow2.f32 %v2792_v60 }
 0x2f6   :  { %3387 = vtanh.f32 %v971_v61 }
 0x2f9   :  { %v3382_v62 = vpop.eup %3381 }
 0x2fa   :  { %v3384_v63 = vpop.eup %3383  ;;  %v813_v9 = vadd.f32 1.0, %v3382_v62 }
 0x2fb   :  { %v894_v18 = vadd.f32 1.0, %v3384_v63 }
 0x2fc   :  { %3389 = vrcp.f32 %v813_v9 }
 0x2fd   :  { %3391 = vrcp.f32 %v894_v18 }
 0x302   :  { %v3386_v19 = vpop.eup %3385 }
 0x303   :  { %v3388_v20 = vpop.eup %3387  ;;  %v1051_v25 = vadd.f32 1.0, %v3386_v19 }
 0x305   :  { %3393 = vrcp.f32 %v1051_v25 }
 0x309   :  { %v3390_v21 = vpop.eup %3389 }
 0x30a   :  { %v3392_v22 = vpop.eup %3391  ;;  %v1056_v24 = vmul.f32 %v3390_v21, %v3388_v20 }
 0x30b   :  { %v1055_v26 = vmul.f32 %v3392_v22, %v1054_v23  ;;  %v1407_v23 = vld [vmem:[#allocation4 + $0x26] sm:$0x3] }
 0x30d   :  { %v1057_v27 = vadd.f32 %v1056_v24, %v1055_v26 }
 0x30f   :  { %3395 = vtanh.f32 %v1057_v27  ;;  %1060 = vst.msk [vmem:[#allocation3] sm:$0x3] %vm44_vm0, %v1057_v27 }
 0x312   :  { %v3394_v28 = vpop.eup %3393 }
 0x316   :  { %v1392_v59 = vld [vmem:[#allocation3] sm:$0x3] }
 0x31c   :  { %v3396_v29 = vpop.eup %3395 }
 0x31d   :  { %v1059_v30 = vmul.f32 %v3396_v29, %v3394_v28  ;;  %v1406_v29 = vld [vmem:[#allocation4 + $0x24] sm:$0x3] }
 0x31f   :  { %1061 = vst.msk [vmem:[#allocation2] sm:$0x3] %vm44_vm0, %v1059_v30  ;;  %1063 = vst.msk [vmem:[#allocation9 + $0x4] sm:$0x3] %vm44_vm0, %v1059_v30 }
 0x326   :  { %v1064_v31 = vld [vmem:[#allocation2] sm:$0x3] }
 0x327   :  { %3129 = vmatmul.mubr.msk.f32.vlgmr.msra.gmra.mxu0 %vm56_vm2, %v1064_v31  ;;  %3140 = vmatmul.mubr.msk.f32.vlgmr.msra.gmra.mxu1 %vm56_vm2, %v1064_v31 }
 0x328   :  { %3143 = vmatpush3.msra.mxu0 %v3616_v10  ;;  %3154 = vmatpush3.msra.mxu1 %v3618_v11 }
 0x329   :  { %3144 = vmatprep.subr.mxu0 %v3549_v0  ;;  %3155 = vmatprep.subr.mxu1 %v3549_v0 }
 0x32a   :  { %3145 = vmatpush3.msra.mxu0 %v3624_v12  ;;  %3156 = vmatpush3.msra.mxu1 %v3626_v13 }
 0x32b   :  { %3146 = vmatprep.subr.mxu0 %v3549_v0  ;;  %3157 = vmatprep.subr.mxu1 %v3549_v0 }
 0x32c   :  { %3147 = vmatpush3.msra.mxu0 %v3632_v14  ;;  %3158 = vmatpush3.msra.mxu1 %v3634_v15 }
 0x32d   :  { %3148 = vmatprep.subr.mxu0 %v3549_v0  ;;  %3159 = vmatprep.subr.mxu1 %v3549_v0 }
 0x32e   :  { %3149 = vmatpush3.msra.mxu0 %v3640_v16  ;;  %3150 = vmatprep.mubr.msk.f32.mxu0 %vm3550_vm1, %v3549_v0 }
 0x32f   :  { %3160 = vmatpush3.msra.mxu1 %v3644_v17  ;;  %3161 = vmatprep.mubr.msk.f32.mxu1 %vm3550_vm1, %v3549_v0 }
 0x330   :  { %3151 = vmatmul.mubr.msk.f32.vlgmr.msra.gmra.mxu0 %vm56_vm2, %v1064_v31  ;;  %3162 = vmatmul.mubr.msk.f32.vlgmr.msra.gmra.mxu1 %vm56_vm2, %v1064_v31 }
 0x331   :  { %3164 = vmatprep.subr.mxu0 %v3549_v0  ;;  %3175 = vmatprep.subr.mxu1 %v3549_v0 }
 0x332   :  { %3165 = vmatpush3.msra.mxu0 %v3586_v1  ;;  %3176 = vmatpush3.msra.mxu1 %v3588_v2 }
 0x333   :  { %3166 = vmatprep.subr.mxu0 %v3549_v0  ;;  %3177 = vmatprep.subr.mxu1 %v3549_v0 }
 0x334   :  { %3167 = vmatpush3.msra.mxu0 %v3590_v3  ;;  %3178 = vmatpush3.msra.mxu1 %v3594_v4 }
 0x335   :  { %3168 = vmatprep.subr.mxu0 %v3549_v0  ;;  %3179 = vmatprep.subr.mxu1 %v3549_v0 }
 0x336   :  { %3169 = vmatpush3.msra.mxu0 %v3598_v5  ;;  %3180 = vmatpush3.msra.mxu1 %v3600_v6 }
 0x337   :  { %3170 = vmatprep.subr.mxu0 %v3549_v0  ;;  %3181 = vmatprep.subr.mxu1 %v3549_v0 }
 0x338   :  { %3171 = vmatpush3.msra.mxu0 %v3606_v7  ;;  %3182 = vmatpush3.msra.mxu1 %v3608_v8 }
 0x339   :  { %3172 = vmatprep.mubr.msk.f32.mxu0 %vm3550_vm1, %v3549_v0  ;;  %3183 = vmatprep.mubr.msk.f32.mxu1 %vm3550_vm1, %v3549_v0 }
 0x33a   :  { %3186 = vmatprep.subr.mxu0 %v3549_v0  ;;  %3197 = vmatprep.subr.mxu1 %v3549_v0 }
 0x3e7   :  { %v1143_v34 = vpop.f32.mrf.mxu0  ;;  %v1224_v35 = vpop.f32.mrf.mxu1 }
 0x3e8   :  { %v1147_v36 = vadd.f32 %v1143_v34, %v1066_v32  ;;  %v1228_v37 = vadd.f32 %v1224_v35, %v1067_v33 }
 0x3e9   :  { %v3130_v38 = vpop.f32.mrf.mxu0  ;;  %v3141_v39 = vpop.f32.mrf.mxu1 }
 0x3ea   :  { %v2794_v40 = vmul.f32 -1.442695, %v1147_v36  ;;  %v2796_v41 = vmul.f32 -1.442695, %v1228_v37 }
 0x3ec   :  { %3397 = vpow2.f32 %v2794_v40 }
 0x3ed   :  { %3399 = vpow2.f32 %v2796_v41 }
 0x3f0   :  { %v1305_v43 = vpop.f32.mrf.mxu0  ;;  %v1381_v44 = vpop.f32.mrf.mxu1 }
 0x3f1   :  { %v1385_v45 = vadd.f32 %v1381_v44, %v1069_v42  ;;  %v1309_v50 = vadd.f32 %v1305_v43, %v1068_v48 }
 0x3f2   :  { %v3152_v46 = vpop.f32.mrf.mxu0  ;;  %v3163_v47 = vpop.f32.mrf.mxu1 }
 0x3f3   :  { %v2799_v49 = vmul.f32 -1.442695, %v1385_v45 }
 0x3f5   :  { %3401 = vpow2.f32 %v2799_v49  ;;  %v1742_v49 = vld [vmem:[#allocation4 + $0x28] sm:$0x3] }
 0x3f6   :  { %3403 = vtanh.f32 %v1309_v50  ;;  %v1743_v50 = vld [vmem:[#allocation4 + $0x2a] sm:$0x3] }
 0x3f9   :  { %v3398_v51 = vpop.eup %3397 }
 0x3fa   :  { %v3400_v52 = vpop.eup %3399  ;;  %v1151_v53 = vadd.f32 1.0, %v3398_v51 }
 0x3fb   :  { %v1232_v54 = vadd.f32 1.0, %v3400_v52 }
 0x3fc   :  { %3405 = vrcp.f32 %v1151_v53 }
 0x3fd   :  { %3407 = vrcp.f32 %v1232_v54 }
 0x402   :  { %v3402_v55 = vpop.eup %3401 }
 0x403   :  { %v3404_v56 = vpop.eup %3403  ;;  %v1389_v61 = vadd.f32 1.0, %v3402_v55 }
 0x405   :  { %3409 = vrcp.f32 %v1389_v61 }
 0x409   :  { %v3406_v57 = vpop.eup %3405 }
 0x40a   :  { %v3408_v58 = vpop.eup %3407  ;;  %v1394_v60 = vmul.f32 %v3406_v57, %v3404_v56 }
 0x40b   :  { %v1393_v62 = vmul.f32 %v3408_v58, %v1392_v59  ;;  %v1745_v59 = vld [vmem:[#allocation4 + $0x2e] sm:$0x3] }
 0x40d   :  { %v1395_v63 = vadd.f32 %v1394_v60, %v1393_v62 }
 0x40f   :  { %3411 = vtanh.f32 %v1395_v63  ;;  %1398 = vst.msk [vmem:[#allocation3] sm:$0x3] %vm44_vm0, %v1395_v63 }
 0x412   :  { %v3410_v9 = vpop.eup %3409 }
 0x416   :  { %v1730_v40 = vld [vmem:[#allocation3] sm:$0x3] }
 0x41c   :  { %v3412_v18 = vpop.eup %3411 }
 0x41d   :  { %v1397_v19 = vmul.f32 %v3412_v18, %v3410_v9  ;;  %v1744_v18 = vld [vmem:[#allocation4 + $0x2c] sm:$0x3] }
 0x41f   :  { %1401 = vst.msk [vmem:[#allocation9 + $0x6] sm:$0x3] %vm44_vm0, %v1397_v19  ;;  %1399 = vst.msk [vmem:[#allocation2] sm:$0x3] %vm44_vm0, %v1397_v19 }
 0x426   :  { %v1402_v20 = vld [vmem:[#allocation2] sm:$0x3] }
 0x427   :  { %3173 = vmatmul.mubr.msk.f32.vlgmr.msra.gmra.mxu0 %vm56_vm2, %v1402_v20  ;;  %3184 = vmatmul.mubr.msk.f32.vlgmr.msra.gmra.mxu1 %vm56_vm2, %v1402_v20 }
 0x428   :  { %3187 = vmatpush3.msra.mxu0 %v3616_v10  ;;  %3198 = vmatpush3.msra.mxu1 %v3618_v11 }
 0x429   :  { %3188 = vmatprep.subr.mxu0 %v3549_v0  ;;  %3199 = vmatprep.subr.mxu1 %v3549_v0 }
 0x42a   :  { %3189 = vmatpush3.msra.mxu0 %v3624_v12  ;;  %3200 = vmatpush3.msra.mxu1 %v3626_v13 }
 0x42b   :  { %3190 = vmatprep.subr.mxu0 %v3549_v0  ;;  %3201 = vmatprep.subr.mxu1 %v3549_v0 }
 0x42c   :  { %3191 = vmatpush3.msra.mxu0 %v3632_v14  ;;  %3202 = vmatpush3.msra.mxu1 %v3634_v15 }
 0x42d   :  { %3192 = vmatprep.subr.mxu0 %v3549_v0  ;;  %3203 = vmatprep.subr.mxu1 %v3549_v0 }
 0x42e   :  { %3193 = vmatpush3.msra.mxu0 %v3640_v16  ;;  %3194 = vmatprep.mubr.msk.f32.mxu0 %vm3550_vm1, %v3549_v0 }
 0x42f   :  { %3204 = vmatpush3.msra.mxu1 %v3644_v17  ;;  %3205 = vmatprep.mubr.msk.f32.mxu1 %vm3550_vm1, %v3549_v0 }
 0x430   :  { %3195 = vmatmul.mubr.msk.f32.vlgmr.msra.gmra.mxu0 %vm56_vm2, %v1402_v20  ;;  %3206 = vmatmul.mubr.msk.f32.vlgmr.msra.gmra.mxu1 %vm56_vm2, %v1402_v20 }
 0x431   :  { %3208 = vmatprep.subr.mxu0 %v3549_v0  ;;  %3219 = vmatprep.subr.mxu1 %v3549_v0 }
 0x432   :  { %3209 = vmatpush3.msra.mxu0 %v3586_v1  ;;  %3220 = vmatpush3.msra.mxu1 %v3588_v2  ;;  %v1404_v1 = vld [vmem:[#allocation4 + $0x20] sm:$0x3]  ;;  %v1405_v2 = vld [vmem:[#allocation4 + $0x22] sm:$0x3] }
 0x433   :  { %3210 = vmatprep.subr.mxu0 %v3549_v0  ;;  %3221 = vmatprep.subr.mxu1 %v3549_v0 }
 0x434   :  { %3211 = vmatpush3.msra.mxu0 %v3590_v3  ;;  %3222 = vmatpush3.msra.mxu1 %v3594_v4 }
 0x435   :  { %3212 = vmatprep.subr.mxu0 %v3549_v0  ;;  %3223 = vmatprep.subr.mxu1 %v3549_v0 }
 0x436   :  { %3213 = vmatpush3.msra.mxu0 %v3598_v5  ;;  %3224 = vmatpush3.msra.mxu1 %v3600_v6 }
 0x437   :  { %3214 = vmatprep.subr.mxu0 %v3549_v0  ;;  %3225 = vmatprep.subr.mxu1 %v3549_v0 }
 0x438   :  { %3215 = vmatpush3.msra.mxu0 %v3606_v7  ;;  %3226 = vmatpush3.msra.mxu1 %v3608_v8 }
 0x439   :  { %3216 = vmatprep.mubr.msk.f32.mxu0 %vm3550_vm1, %v3549_v0  ;;  %3227 = vmatprep.mubr.msk.f32.mxu1 %vm3550_vm1, %v3549_v0 }
 0x43a   :  { %3230 = vmatprep.subr.mxu0 %v3549_v0  ;;  %3241 = vmatprep.subr.mxu1 %v3549_v0 }
 0x4e7   :  { %v1481_v3 = vpop.f32.mrf.mxu0  ;;  %v1562_v4 = vpop.f32.mrf.mxu1 }
 0x4e8   :  { %v1485_v5 = vadd.f32 %v1481_v3, %v1404_v1  ;;  %v1566_v6 = vadd.f32 %v1562_v4, %v1405_v2 }
 0x4e9   :  { %v3174_v21 = vpop.f32.mrf.mxu0  ;;  %v3185_v7 = vpop.f32.mrf.mxu1 }
 0x4ea   :  { %v2801_v22 = vmul.f32 -1.442695, %v1485_v5  ;;  %v2803_v8 = vmul.f32 -1.442695, %v1566_v6 }
 0x4ec   :  { %3413 = vpow2.f32 %v2801_v22 }
 0x4ed   :  { %3415 = vpow2.f32 %v2803_v8 }
 0x4f0   :  { %v1643_v24 = vpop.f32.mrf.mxu0  ;;  %v1719_v25 = vpop.f32.mrf.mxu1 }
 0x4f1   :  { %v1723_v26 = vadd.f32 %v1719_v25, %v1407_v23  ;;  %v1647_v31 = vadd.f32 %v1643_v24, %v1406_v29  ;;  %v3932_v29 = vld [vmem:[#allocation7 + $0x58] sm:$0xff] }
 0x4f2   :  { %v3196_v27 = vpop.f32.mrf.mxu0  ;;  %v3207_v28 = vpop.f32.mrf.mxu1 }
 0x4f3   :  { %v2806_v30 = vmul.f32 -1.442695, %v1723_v26 }
 0x4f5   :  { %3417 = vpow2.f32 %v2806_v30  ;;  %v3934_v30 = vld [vmem:[#allocation7 + $0x78] sm:$0xff] }
 0x4f6   :  { %3419 = vtanh.f32 %v1647_v31 }
 0x4f9   :  { %v3414_v32 = vpop.eup %3413 }
 0x4fa   :  { %v3416_v33 = vpop.eup %3415  ;;  %v1489_v34 = vadd.f32 1.0, %v3414_v32  ;;  %v3938_v32 = vld [vmem:[#allocation7 + $0x50] sm:$0xff] }
 0x4fb   :  { %v1570_v35 = vadd.f32 1.0, %v3416_v33  ;;  %v3940_v33 = vld [vmem:[#allocation7 + $0x70] sm:$0xff] }
 0x4fc   :  { %3421 = vrcp.f32 %v1489_v34  ;;  %v3946_v34 = vld [vmem:[#allocation7 + $0x48] sm:$0xff] }
 0x4fd   :  { %3423 = vrcp.f32 %v1570_v35  ;;  %v3948_v35 = vld [vmem:[#allocation7 + $0x68] sm:$0xff] }
 0x502   :  { %v3418_v36 = vpop.eup %3417 }
 0x503   :  { %v3420_v37 = vpop.eup %3419  ;;  %v1727_v42 = vadd.f32 1.0, %v3418_v36  ;;  %v3954_v36 = vld [vmem:[#allocation7 + $0x40] sm:$0xff] }
 0x505   :  { %3425 = vrcp.f32 %v1727_v42 }
 0x509   :  { %v3422_v38 = vpop.eup %3421 }
 0x50a   :  { %v3424_v39 = vpop.eup %3423  ;;  %v1732_v41 = vmul.f32 %v3422_v38, %v3420_v37  ;;  %v3958_v37 = vld [vmem:[#allocation7 + $0x60] sm:$0xff]  ;;  %v2080_v38 = vld [vmem:[#allocation4 + $0x30] sm:$0x3] }
 0x50b   :  { %v1731_v43 = vmul.f32 %v3424_v39, %v1730_v40  ;;  %v2081_v39 = vld [vmem:[#allocation4 + $0x32] sm:$0x3] }
 0x50d   :  { %v1733_v44 = vadd.f32 %v1732_v41, %v1731_v43 }
 0x50f   :  { %3427 = vtanh.f32 %v1733_v44  ;;  %1736 = vst.msk [vmem:[#allocation3] sm:$0x3] %vm44_vm0, %v1733_v44 }
 0x512   :  { %v3426_v45 = vpop.eup %3425 }
 0x516   :  { %v2068_v22 = vld [vmem:[#allocation3] sm:$0x3] }
 0x51c   :  { %v3428_v46 = vpop.eup %3427 }
 0x51d   :  { %v1735_v47 = vmul.f32 %v3428_v46, %v3426_v45 }
 0x51f   :  { %1739 = vst.msk [vmem:[#allocation9 + $0x8] sm:$0x3] %vm44_vm0, %v1735_v47  ;;  %1737 = vst.msk [vmem:[#allocation2] sm:$0x3] %vm44_vm0, %v1735_v47 }
 0x526   :  { %v1740_v48 = vld [vmem:[#allocation2] sm:$0x3] }
 0x527   :  { %3217 = vmatmul.mubr.msk.f32.vlgmr.msra.gmra.mxu0 %vm56_vm2, %v1740_v48  ;;  %3228 = vmatmul.mubr.msk.f32.vlgmr.msra.gmra.mxu1 %vm56_vm2, %v1740_v48 }
 0x528   :  { %3231 = vmatpush3.msra.mxu0 %v3616_v10  ;;  %3242 = vmatpush3.msra.mxu1 %v3618_v11  ;;  %v3897_v10 = vld [vmem:[#allocation7 + $0x18] sm:$0xff] }
 0x529   :  { %3232 = vmatprep.subr.mxu0 %v3549_v0  ;;  %3243 = vmatprep.subr.mxu1 %v3549_v0  ;;  %v3899_v11 = vld [vmem:[#allocation7 + $0x38] sm:$0xff] }
 0x52a   :  { %3233 = vmatpush3.msra.mxu0 %v3624_v12  ;;  %3244 = vmatpush3.msra.mxu1 %v3626_v13  ;;  %v3901_v12 = vld [vmem:[#allocation7 + $0x10] sm:$0xff] }
 0x52b   :  { %3234 = vmatprep.subr.mxu0 %v3549_v0  ;;  %3245 = vmatprep.subr.mxu1 %v3549_v0  ;;  %v3905_v13 = vld [vmem:[#allocation7 + $0x30] sm:$0xff] }
 0x52c   :  { %3235 = vmatpush3.msra.mxu0 %v3632_v14  ;;  %3246 = vmatpush3.msra.mxu1 %v3634_v15  ;;  %v3909_v14 = vld [vmem:[#allocation7 + $0x8] sm:$0xff] }
 0x52d   :  { %3236 = vmatprep.subr.mxu0 %v3549_v0  ;;  %3247 = vmatprep.subr.mxu1 %v3549_v0  ;;  %v3911_v15 = vld [vmem:[#allocation7 + $0x28] sm:$0xff] }
 0x52e   :  { %3237 = vmatpush3.msra.mxu0 %v3640_v16  ;;  %3238 = vmatprep.mubr.msk.f32.mxu0 %vm3550_vm1, %v3549_v0  ;;  %v3917_v16 = vld [vmem:[#allocation7] sm:$0xff] }
 0x52f   :  { %3248 = vmatpush3.msra.mxu1 %v3644_v17  ;;  %3249 = vmatprep.mubr.msk.f32.mxu1 %vm3550_vm1, %v3549_v0  ;;  %v3919_v17 = vld [vmem:[#allocation7 + $0x20] sm:$0xff] }
 0x530   :  { %3239 = vmatmul.mubr.msk.f32.vlgmr.msra.gmra.mxu0 %vm56_vm2, %v1740_v48  ;;  %3250 = vmatmul.mubr.msk.f32.vlgmr.msra.gmra.mxu1 %vm56_vm2, %v1740_v48  ;;  %v2083_v48 = vld [vmem:[#allocation4 + $0x36] sm:$0x3] }
 0x531   :  { %3252 = vmatprep.subr.mxu0 %v3549_v0  ;;  %3263 = vmatprep.subr.mxu1 %v3549_v0 }
 0x532   :  { %3260 = vmatprep.mubr.msk.f32.mxu0 %vm3550_vm1, %v3549_v0  ;;  %3271 = vmatprep.mubr.msk.f32.mxu1 %vm3550_vm1, %v3549_v0 }
 0x533   :  { %3253 = vmatpush3.msra.mxu0 %v3897_v10  ;;  %3264 = vmatpush3.msra.mxu1 %v3899_v11 }
 0x534   :  { %3254 = vmatprep.subr.mxu0 %v3549_v0  ;;  %3265 = vmatprep.subr.mxu1 %v3549_v0 }
 0x535   :  { %3255 = vmatpush3.msra.mxu0 %v3901_v12  ;;  %3266 = vmatpush3.msra.mxu1 %v3905_v13 }
 0x536   :  { %3256 = vmatprep.subr.mxu0 %v3549_v0  ;;  %3267 = vmatprep.subr.mxu1 %v3549_v0 }
 0x537   :  { %3257 = vmatpush3.msra.mxu0 %v3909_v14  ;;  %3268 = vmatpush3.msra.mxu1 %v3911_v15 }
 0x538   :  { %3258 = vmatprep.subr.mxu0 %v3549_v0  ;;  %3269 = vmatprep.subr.mxu1 %v3549_v0 }
 0x539   :  { %3259 = vmatpush3.msra.mxu0 %v3917_v16  ;;  %3270 = vmatpush3.msra.mxu1 %v3919_v17 }
 0x53a   :  { %3274 = vmatprep.subr.mxu0 %v3549_v0  ;;  %3285 = vmatprep.subr.mxu1 %v3549_v0 }
 0x5e7   :  { %v1819_v51 = vpop.f32.mrf.mxu0  ;;  %v1900_v52 = vpop.f32.mrf.mxu1 }
 0x5e8   :  { %v1823_v53 = vadd.f32 %v1819_v51, %v1742_v49  ;;  %v1904_v54 = vadd.f32 %v1900_v52, %v1743_v50 }
 0x5e9   :  { %v3218_v55 = vpop.f32.mrf.mxu0  ;;  %v3229_v56 = vpop.f32.mrf.mxu1 }
 0x5ea   :  { %v2808_v57 = vmul.f32 -1.442695, %v1823_v53  ;;  %v2810_v58 = vmul.f32 -1.442695, %v1904_v54 }
 0x5ec   :  { %3429 = vpow2.f32 %v2808_v57 }
 0x5ed   :  { %3431 = vpow2.f32 %v2810_v58 }
 0x5f0   :  { %v1981_v60 = vpop.f32.mrf.mxu0  ;;  %v2057_v61 = vpop.f32.mrf.mxu1 }
 0x5f1   :  { %v2061_v62 = vadd.f32 %v2057_v61, %v1745_v59  ;;  %v1985_v20 = vadd.f32 %v1981_v60, %v1744_v18 }
 0x5f2   :  { %v3240_v63 = vpop.f32.mrf.mxu0  ;;  %v3251_v9 = vpop.f32.mrf.mxu1 }
 0x5f3   :  { %v2813_v19 = vmul.f32 -1.442695, %v2061_v62 }
 0x5f5   :  { %3433 = vpow2.f32 %v2813_v19  ;;  %v2418_v19 = vld [vmem:[#allocation4 + $0x38] sm:$0x3] }
 0x5f6   :  { %3435 = vtanh.f32 %v1985_v20  ;;  %v2419_v20 = vld [vmem:[#allocation4 + $0x3a] sm:$0x3] }
 0x5f9   :  { %v3430_v1 = vpop.eup %3429 }
 0x5fa   :  { %v3432_v2 = vpop.eup %3431  ;;  %v1827_v3 = vadd.f32 1.0, %v3430_v1 }
 0x5fb   :  { %v1908_v4 = vadd.f32 1.0, %v3432_v2 }
 0x5fc   :  { %3437 = vrcp.f32 %v1827_v3 }
 0x5fd   :  { %3439 = vrcp.f32 %v1908_v4 }
 0x602   :  { %v3434_v5 = vpop.eup %3433 }
 0x603   :  { %v3436_v6 = vpop.eup %3435  ;;  %v2065_v23 = vadd.f32 1.0, %v3434_v5 }
 0x605   :  { %3441 = vrcp.f32 %v2065_v23 }
 0x609   :  { %v3438_v21 = vpop.eup %3437 }
 0x60a   :  { %v3440_v7 = vpop.eup %3439  ;;  %v2070_v8 = vmul.f32 %v3438_v21, %v3436_v6 }
 0x60b   :  { %v2069_v24 = vmul.f32 %v3440_v7, %v2068_v22  ;;  %v2421_v22 = vld [vmem:[#allocation4 + $0x3e] sm:$0x3] }
 0x60d   :  { %v2071_v25 = vadd.f32 %v2070_v8, %v2069_v24 }
 0x60f   :  { %3443 = vtanh.f32 %v2071_v25  ;;  %2074 = vst.msk [vmem:[#allocation3] sm:$0x3] %vm44_vm0, %v2071_v25 }
 0x612   :  { %v3442_v26 = vpop.eup %3441 }
 0x616   :  { %v2406_v57 = vld [vmem:[#allocation3] sm:$0x3] }
 0x61c   :  { %v3444_v27 = vpop.eup %3443 }
 0x61d   :  { %v2073_v28 = vmul.f32 %v3444_v27, %v3442_v26  ;;  %v2420_v26 = vld [vmem:[#allocation4 + $0x3c] sm:$0x3] }
 0x61f   :  { %2077 = vst.msk [vmem:[#allocation9 + $0xa] sm:$0x3] %vm44_vm0, %v2073_v28  ;;  %2075 = vst.msk [vmem:[#allocation2] sm:$0x3] %vm44_vm0, %v2073_v28 }
 0x626   :  { %v2078_v31 = vld [vmem:[#allocation2] sm:$0x3] }
 0x627   :  { %3261 = vmatmul.mubr.msk.f32.vlgmr.msra.gmra.mxu0 %vm56_vm2, %v2078_v31  ;;  %3272 = vmatmul.mubr.msk.f32.vlgmr.msra.gmra.mxu1 %vm56_vm2, %v2078_v31 }
 0x628   :  { %3275 = vmatpush3.msra.mxu0 %v3932_v29  ;;  %3286 = vmatpush3.msra.mxu1 %v3934_v30 }
 0x629   :  { %3276 = vmatprep.subr.mxu0 %v3549_v0  ;;  %3287 = vmatprep.subr.mxu1 %v3549_v0 }
 0x62a   :  { %3277 = vmatpush3.msra.mxu0 %v3938_v32  ;;  %3288 = vmatpush3.msra.mxu1 %v3940_v33 }
 0x62b   :  { %3278 = vmatprep.subr.mxu0 %v3549_v0  ;;  %3289 = vmatprep.subr.mxu1 %v3549_v0 }
 0x62c   :  { %3279 = vmatpush3.msra.mxu0 %v3946_v34  ;;  %3290 = vmatpush3.msra.mxu1 %v3948_v35 }
 0x62d   :  { %3280 = vmatprep.subr.mxu0 %v3549_v0  ;;  %3291 = vmatprep.subr.mxu1 %v3549_v0 }
 0x62e   :  { %3281 = vmatpush3.msra.mxu0 %v3954_v36  ;;  %3282 = vmatprep.mubr.msk.f32.mxu0 %vm3550_vm1, %v3549_v0 }
 0x62f   :  { %3292 = vmatpush3.msra.mxu1 %v3958_v37  ;;  %3293 = vmatprep.mubr.msk.f32.mxu1 %vm3550_vm1, %v3549_v0 }
 0x630   :  { %3283 = vmatmul.mubr.msk.f32.vlgmr.msra.gmra.mxu0 %vm56_vm2, %v2078_v31  ;;  %3294 = vmatmul.mubr.msk.f32.vlgmr.msra.gmra.mxu1 %vm56_vm2, %v2078_v31 }
 0x631   :  { %3296 = vmatprep.subr.mxu0 %v3549_v0  ;;  %3307 = vmatprep.subr.mxu1 %v3549_v0 }
 0x632   :  { %3297 = vmatpush3.msra.mxu0 %v3897_v10  ;;  %3308 = vmatpush3.msra.mxu1 %v3899_v11 }
 0x633   :  { %3298 = vmatprep.subr.mxu0 %v3549_v0  ;;  %3309 = vmatprep.subr.mxu1 %v3549_v0 }
 0x634   :  { %3299 = vmatpush3.msra.mxu0 %v3901_v12  ;;  %3310 = vmatpush3.msra.mxu1 %v3905_v13 }
 0x635   :  { %3300 = vmatprep.subr.mxu0 %v3549_v0  ;;  %3311 = vmatprep.subr.mxu1 %v3549_v0 }
 0x636   :  { %3301 = vmatpush3.msra.mxu0 %v3909_v14  ;;  %3312 = vmatpush3.msra.mxu1 %v3911_v15  ;;  %v2082_v15 = vld [vmem:[#allocation4 + $0x34] sm:$0x3] }
 0x637   :  { %3302 = vmatprep.subr.mxu0 %v3549_v0  ;;  %3313 = vmatprep.subr.mxu1 %v3549_v0 }
 0x638   :  { %3303 = vmatpush3.msra.mxu0 %v3917_v16  ;;  %3314 = vmatpush3.msra.mxu1 %v3919_v17 }
 0x639   :  { %3304 = vmatprep.mubr.msk.f32.mxu0 %vm3550_vm1, %v3549_v0  ;;  %3315 = vmatprep.mubr.msk.f32.mxu1 %vm3550_vm1, %v3549_v0 }
 0x63a   :  { %3318 = vmatprep.subr.mxu0 %v3549_v0  ;;  %3329 = vmatprep.subr.mxu1 %v3549_v0 }
 0x6e7   :  { %v2157_v40 = vpop.f32.mrf.mxu0  ;;  %v2238_v41 = vpop.f32.mrf.mxu1 }
 0x6e8   :  { %v2161_v42 = vadd.f32 %v2157_v40, %v2080_v38  ;;  %v2242_v43 = vadd.f32 %v2238_v41, %v2081_v39 }
 0x6e9   :  { %v3262_v44 = vpop.f32.mrf.mxu0  ;;  %v3273_v45 = vpop.f32.mrf.mxu1 }
 0x6ea   :  { %v2815_v46 = vmul.f32 -1.442695, %v2161_v42  ;;  %v2817_v47 = vmul.f32 -1.442695, %v2242_v43 }
 0x6ec   :  { %3445 = vpow2.f32 %v2815_v46 }
 0x6ed   :  { %3447 = vpow2.f32 %v2817_v47 }
 0x6f0   :  { %v2319_v10 = vpop.f32.mrf.mxu0  ;;  %v2395_v11 = vpop.f32.mrf.mxu1 }
 0x6f1   :  { %v2399_v12 = vadd.f32 %v2395_v11, %v2083_v48  ;;  %v2323_v17 = vadd.f32 %v2319_v10, %v2082_v15 }
 0x6f2   :  { %v3284_v13 = vpop.f32.mrf.mxu0  ;;  %v3295_v14 = vpop.f32.mrf.mxu1 }
 0x6f3   :  { %v2820_v16 = vmul.f32 -1.442695, %v2399_v12 }
 0x6f5   :  { %3449 = vpow2.f32 %v2820_v16 }
 0x6f6   :  { %3451 = vtanh.f32 %v2323_v17 }
 0x6f9   :  { %v3446_v49 = vpop.eup %3445 }
 0x6fa   :  { %v3448_v50 = vpop.eup %3447  ;;  %v2165_v51 = vadd.f32 1.0, %v3446_v49 }
 0x6fb   :  { %v2246_v52 = vadd.f32 1.0, %v3448_v50 }
 0x6fc   :  { %3453 = vrcp.f32 %v2165_v51 }
 0x6fd   :  { %3455 = vrcp.f32 %v2246_v52 }
 0x702   :  { %v3450_v53 = vpop.eup %3449 }
 0x703   :  { %v3452_v54 = vpop.eup %3451  ;;  %v2403_v59 = vadd.f32 1.0, %v3450_v53 }
 0x705   :  { %3457 = vrcp.f32 %v2403_v59 }
 0x709   :  { %v3454_v55 = vpop.eup %3453 }
 0x70a   :  { %v3456_v56 = vpop.eup %3455  ;;  %v2408_v58 = vmul.f32 %v3454_v55, %v3452_v54 }
 0x70b   :  { %v2407_v60 = vmul.f32 %v3456_v56, %v2406_v57 }
 0x70d   :  { %v2409_v61 = vadd.f32 %v2408_v58, %v2407_v60 }
 0x70f   :  { %3459 = vtanh.f32 %v2409_v61  ;;  %2412 = vst.msk [vmem:[#allocation3] sm:$0x3] %vm44_vm0, %v2409_v61 }
 0x712   :  { %v3458_v62 = vpop.eup %3457 }
 0x71c   :  { %v3460_v63 = vpop.eup %3459 }
 0x71d   :  { %v2411_v9 = vmul.f32 %v3460_v63, %v3458_v62 }
 0x71f   :  { %2415 = vst.msk [vmem:[#allocation9 + $0xc] sm:$0x3] %vm44_vm0, %v2411_v9  ;;  %2413 = vst.msk [vmem:[#allocation2] sm:$0x3] %vm44_vm0, %v2411_v9 }
 0x726   :  { %v2416_v18 = vld [vmem:[#allocation2] sm:$0x3] }
 0x727   :  { %3305 = vmatmul.mubr.msk.f32.vlgmr.msra.gmra.mxu0 %vm56_vm2, %v2416_v18  ;;  %3316 = vmatmul.mubr.msk.f32.vlgmr.msra.gmra.mxu1 %vm56_vm2, %v2416_v18 }
 0x728   :  { %3319 = vmatpush3.msra.mxu0 %v3932_v29  ;;  %3330 = vmatpush3.msra.mxu1 %v3934_v30 }
 0x729   :  { %3320 = vmatprep.subr.mxu0 %v3549_v0  ;;  %3331 = vmatprep.subr.mxu1 %v3549_v0 }
 0x72a   :  { %3321 = vmatpush3.msra.mxu0 %v3938_v32  ;;  %3332 = vmatpush3.msra.mxu1 %v3940_v33 }
 0x72b   :  { %3322 = vmatprep.subr.mxu0 %v3549_v0  ;;  %3333 = vmatprep.subr.mxu1 %v3549_v0 }
 0x72c   :  { %3323 = vmatpush3.msra.mxu0 %v3946_v34  ;;  %3334 = vmatpush3.msra.mxu1 %v3948_v35 }
 0x72d   :  { %3324 = vmatprep.subr.mxu0 %v3549_v0  ;;  %3335 = vmatprep.subr.mxu1 %v3549_v0 }
 0x72e   :  { %3325 = vmatpush3.msra.mxu0 %v3954_v36  ;;  %3326 = vmatprep.mubr.msk.f32.mxu0 %vm3550_vm1, %v3549_v0 }
 0x72f   :  { %3336 = vmatpush3.msra.mxu1 %v3958_v37  ;;  %3337 = vmatprep.mubr.msk.f32.mxu1 %vm3550_vm1, %v3549_v0  ;;  %v2744_v37 = vld [vmem:[#allocation3] sm:$0x3] }
 0x730   :  { %3327 = vmatmul.mubr.msk.f32.vlgmr.msra.gmra.mxu0 %vm56_vm2, %v2416_v18  ;;  %3338 = vmatmul.mubr.msk.f32.vlgmr.msra.gmra.mxu1 %vm56_vm2, %v2416_v18 }
 0x7e7   :  { %v2495_v1 = vpop.f32.mrf.mxu0  ;;  %v2576_v2 = vpop.f32.mrf.mxu1 }
 0x7e8   :  { %v2499_v3 = vadd.f32 %v2495_v1, %v2418_v19  ;;  %v2580_v4 = vadd.f32 %v2576_v2, %v2419_v20 }
 0x7e9   :  { %v3306_v5 = vpop.f32.mrf.mxu0  ;;  %v3317_v6 = vpop.f32.mrf.mxu1 }
 0x7ea   :  { %v2822_v21 = vmul.f32 -1.442695, %v2499_v3  ;;  %v2824_v7 = vmul.f32 -1.442695, %v2580_v4 }
 0x7ec   :  { %3461 = vpow2.f32 %v2822_v21 }
 0x7ed   :  { %3463 = vpow2.f32 %v2824_v7 }
 0x7f0   :  { %v2657_v8 = vpop.f32.mrf.mxu0  ;;  %v2733_v23 = vpop.f32.mrf.mxu1 }
 0x7f1   :  { %v2737_v0 = vadd.f32 %v2733_v23, %v2421_v22  ;;  %v2661_v28 = vadd.f32 %v2657_v8, %v2420_v26 }
 0x7f2   :  { %v3328_v24 = vpop.f32.mrf.mxu0  ;;  %v3339_v25 = vpop.f32.mrf.mxu1 }
 0x7f3   :  { %v2827_v27 = vmul.f32 -1.442695, %v2737_v0 }
 0x7f5   :  { %3465 = vpow2.f32 %v2827_v27 }
 0x7f6   :  { %3467 = vtanh.f32 %v2661_v28 }
 0x7f9   :  { %v3462_v29 = vpop.eup %3461 }
 0x7fa   :  { %v3464_v30 = vpop.eup %3463  ;;  %v2503_v31 = vadd.f32 1.0, %v3462_v29 }
 0x7fb   :  { %v2584_v32 = vadd.f32 1.0, %v3464_v30 }
 0x7fc   :  { %3469 = vrcp.f32 %v2503_v31 }
 0x7fd   :  { %3471 = vrcp.f32 %v2584_v32 }
 0x802   :  { %v3466_v33 = vpop.eup %3465 }
 0x803   :  { %v3468_v34 = vpop.eup %3467  ;;  %v2741_v39 = vadd.f32 1.0, %v3466_v33 }
 0x805   :  { %3473 = vrcp.f32 %v2741_v39 }
 0x809   :  { %v3470_v35 = vpop.eup %3469 }
 0x80a   :  { %v3472_v36 = vpop.eup %3471  ;;  %v2746_v38 = vmul.f32 %v3470_v35, %v3468_v34 }
 0x80b   :  { %v2745_v40 = vmul.f32 %v3472_v36, %v2744_v37 }
 0x80d   :  { %v2747_v41 = vadd.f32 %v2746_v38, %v2745_v40 }
 0x80f   :  { %3475 = vtanh.f32 %v2747_v41  ;;  %2750 = vst.msk [vmem:[#allocation3] sm:$0x3] %vm44_vm0, %v2747_v41 }
 0x812   :  { %v3474_v42 = vpop.eup %3473 }
 0x81c   :  { %v3476_v43 = vpop.eup %3475 }
 0x81d   :  { %v2749_v44 = vmul.f32 %v3476_v43, %v3474_v42 }
 0x81f   :  { %2751 = vst.msk [vmem:[#allocation2] sm:$0x3] %vm44_vm0, %v2749_v44  ;;  %2753 = vst.msk [vmem:[#allocation9 + $0xe] sm:$0x3] %vm44_vm0, %v2749_v44 }
 0x820   :  { %3528 = shalt.err (!%p3525_p0)
}
 0x821   :  { %2765 = dma.vmem_to_hbm [thread:$0]  %s2760_s1, 256, %s4028_s2, [#allocation6], %s3544_s12, %s3544_s12, %s3545_s13  }
 0x822   :  { %3541 = dma.done.wait [#allocation6], 256  }
 0x823   :  { %3542 = vsyncadd [#allocation6], 4294967040 }
 0x824   :  { %2769 = vsyncpa [#allocation5], 1 }
 0x825   :  { %2770 = vsyncpa [#allocation8], 1 }
 0x826   :  { %2771 = vsyncpa [#allocation6], 1 }

</bundles_post_ra>
